<compile_context>
chip_gen: v7x
topology: tpu7x:2x2x1
jax: 0.10.0
libtpu: 0.0.40
codegen_flags: <defaults>
</compile_context>

<pallas_src>
from functools import partial

import jax
import jax.numpy as jnp
from jax.experimental import pallas as pl
from jax.experimental.pallas import tpu as pltpu


_LN_EPS = 1e-5


# ---------------------------------------------------------------------------
# per-generation budget / tile preferences
# ---------------------------------------------------------------------------
def _detect_vmem_bytes():
    try:
        return int(pltpu.get_tpu_info().vmem_capacity_bytes)
    except Exception:
        return 64 * 1024 * 1024          # conservative (v7x-sized) fallback


_TPU_VMEM = _detect_vmem_bytes()
_VMEM_LIMIT = min((_TPU_VMEM * 3) // 4, 100 * 1024 * 1024)
_BIG_VMEM = _TPU_VMEM >= 100 * 1024 * 1024   # v5e / v6e (128 MiB) vs v7x (64 MiB)
_TM_PREF = 512 if _BIG_VMEM else 256
_TN_PREF = 512 if _BIG_VMEM else 256
_TK_PREF = 512
_TH_PREF = 512


def _choose_tile(dim, pref, align):
    """Largest `align`-aligned divisor of `dim` that is <= pref.

    Returns the full dim when it is small or when no aligned divisor exists
    (a full-extent block is always legal w.r.t. the (8,128) constraint).
    No jnp.pad of activations is ever needed.
    """
    if dim <= pref:
        return dim
    t = (pref // align) * align
    while t >= align:
        if dim % t == 0:
            return t
        t -= align
    return dim


def _layer_norm_rows(y, g, b, eps):
    mu = jnp.mean(y, axis=-1, keepdims=True)
    yc = y - mu
    var = jnp.mean(yc * yc, axis=-1, keepdims=True)
    return yc * jax.lax.rsqrt(var + eps) * g + b


# ---------------------------------------------------------------------------
# generic tiled linear:  out = act(x @ w + b)
#   x bf16 (M,K), w bf16 (K,N), b f32 (N,) -> out bf16 (default) or f32.
#   f32 output accumulates directly into the resident output block (no scratch).
# ---------------------------------------------------------------------------
def _linear_kernel(x_ref, w_ref, b_ref, o_ref, *scratch, act):
    acc_ref = scratch[0] if scratch else o_ref
    k = pl.program_id(2)

    @pl.when(k == 0)
    def _():
        acc_ref[...] = jnp.zeros_like(acc_ref)

    acc_ref[...] += jnp.dot(x_ref[...], w_ref[...],
                            preferred_element_type=jnp.float32)

    @pl.when(k == pl.num_programs(2) - 1)
    def _():
        y = acc_ref[...] + b_ref[...]
        if act == "relu":
            y = jnp.maximum(y, 0.0)
        o_ref[...] = y.astype(o_ref.dtype)


def pallas_linear(x, w, b, out_dtype=jnp.bfloat16, act=None,
                  tm=None, tk=None, tn=None):
    M, K = x.shape
    N = w.shape[1]
    tm = _choose_tile(M, tm or _TM_PREF, 8)
    tk = _choose_tile(K, tk or _TK_PREF, 128)
    tn = _choose_tile(N, tn or _TN_PREF, 128)
    out_dtype = jnp.dtype(out_dtype)
    direct = out_dtype == jnp.dtype(jnp.float32)
    scratch = [] if direct else [pltpu.VMEM((tm, tn), jnp.float32)]

    return pl.pallas_call(
        partial(_linear_kernel, act=act),
        out_shape=jax.ShapeDtypeStruct((M, N), out_dtype),
        grid=(M // tm, N // tn, K // tk),
        in_specs=[
            pl.BlockSpec((tm, tk), lambda i, j, k: (i, k)),
            pl.BlockSpec((tk, tn), lambda i, j, k: (k, j)),
            pl.BlockSpec((1, tn), lambda i, j, k: (0, j)),
        ],
        out_specs=pl.BlockSpec((tm, tn), lambda i, j, k: (i, j)),
        scratch_shapes=scratch,
        compiler_params=pltpu.CompilerParams(
            dimension_semantics=("parallel", "parallel", "arbitrary"),
            vmem_limit_bytes=_VMEM_LIMIT),
    )(x.astype(jnp.bfloat16), w.astype(jnp.bfloat16),
      b.reshape(1, N).astype(jnp.float32))


# ---------------------------------------------------------------------------
# fused linear + residual add + LayerNorm:  out = LN(x @ w + b + res)
# (N is the model dim F, kept whole so LN can reduce over it.)
# ---------------------------------------------------------------------------
def _linear_res_ln_kernel(x_ref, w_ref, b_ref, r_ref, g_ref, be_ref,
                          o_ref, acc_ref, *, eps):
    k = pl.program_id(1)

    @pl.when(k == 0)
    def _():
        acc_ref[...] = jnp.zeros_like(acc_ref)

    acc_ref[...] += jnp.dot(x_ref[...], w_ref[...],
                            preferred_element_type=jnp.float32)

    @pl.when(k == pl.num_programs(1) - 1)
    def _():
        y = acc_ref[...] + b_ref[...] + r_ref[...].astype(jnp.float32)
        o_ref[...] = _layer_norm_rows(y, g_ref[...], be_ref[...], eps).astype(o_ref.dtype)


def pallas_linear_res_ln(x, w, b, res, g, beta, eps=_LN_EPS, tm=None, tk=None):
    """LN((x @ w + b) + res). x bf16 (M,K); w bf16 (K,F); res bf16 (M,F)."""
    M, K = x.shape
    F = w.shape[1]
    tm = _choose_tile(M, tm or _TM_PREF, 8)
    tk = _choose_tile(K, tk or _TK_PREF, 128)

    return pl.pallas_call(
        partial(_linear_res_ln_kernel, eps=eps),
        out_shape=jax.ShapeDtypeStruct((M, F), jnp.bfloat16),
        grid=(M // tm, K // tk),
        in_specs=[
            pl.BlockSpec((tm, tk), lambda i, k: (i, k)),
            pl.BlockSpec((tk, F), lambda i, k: (k, 0)),
            pl.BlockSpec((1, F), lambda i, k: (0, 0)),
            pl.BlockSpec((tm, F), lambda i, k: (i, 0)),
            pl.BlockSpec((1, F), lambda i, k: (0, 0)),
            pl.BlockSpec((1, F), lambda i, k: (0, 0)),
        ],
        out_specs=pl.BlockSpec((tm, F), lambda i, k: (i, 0)),
        scratch_shapes=[pltpu.VMEM((tm, F), jnp.float32)],
        compiler_params=pltpu.CompilerParams(
            dimension_semantics=("parallel", "arbitrary"),
            vmem_limit_bytes=_VMEM_LIMIT),
    )(x.astype(jnp.bfloat16), w, b.reshape(1, F).astype(jnp.float32),
      res.astype(jnp.bfloat16), g.reshape(1, F).astype(jnp.float32),
      beta.reshape(1, F).astype(jnp.float32))


# ---------------------------------------------------------------------------
# fused MLP + residual + LayerNorm:
#   out = LN(relu(x @ w1 + b1) @ w2 + b2 + res)
# grid loops over hidden-dim chunks; the (M, H) hidden never touches HBM.
# ---------------------------------------------------------------------------
def _mlp_res_ln_kernel(x_ref, w1_ref, b1_ref, w2_ref, b2_ref, r_ref, g_ref, be_ref,
                       o_ref, acc_ref, *, eps):
    h = pl.program_id(1)

    @pl.when(h == 0)
    def _():
        acc_ref[...] = jnp.zeros_like(acc_ref)

    hidden = jnp.dot(x_ref[...], w1_ref[...], preferred_element_type=jnp.float32)
    hidden = jnp.maximum(hidden + b1_ref[...], 0.0)
    acc_ref[...] += jnp.dot(hidden.astype(jnp.bfloat16), w2_ref[...],
                            preferred_element_type=jnp.float32)

    @pl.when(h == pl.num_programs(1) - 1)
    def _():
        y = acc_ref[...] + b2_ref[...] + r_ref[...].astype(jnp.float32)
        o_ref[...] = _layer_norm_rows(y, g_ref[...], be_ref[...], eps).astype(o_ref.dtype)


def pallas_mlp_res_ln(x, w1, b1, w2, b2, res, g, beta, eps=_LN_EPS, tm=None, th=None):
    """x/res bf16 (M,F); w1 bf16 (F,H); w2 bf16 (H,F)."""
    M, F = x.shape
    H = w1.shape[1]
    tm = _choose_tile(M, tm or _TM_PREF, 8)
    th = _choose_tile(H, th or _TH_PREF, 128)

    return pl.pallas_call(
        partial(_mlp_res_ln_kernel, eps=eps),
        out_shape=jax.ShapeDtypeStruct((M, F), jnp.bfloat16),
        grid=(M // tm, H // th),
        in_specs=[
            pl.BlockSpec((tm, F), lambda i, h: (i, 0)),
            pl.BlockSpec((F, th), lambda i, h: (0, h)),
            pl.BlockSpec((1, th), lambda i, h: (0, h)),
            pl.BlockSpec((th, F), lambda i, h: (h, 0)),
            pl.BlockSpec((1, F), lambda i, h: (0, 0)),
            pl.BlockSpec((tm, F), lambda i, h: (i, 0)),
            pl.BlockSpec((1, F), lambda i, h: (0, 0)),
            pl.BlockSpec((1, F), lambda i, h: (0, 0)),
        ],
        out_specs=pl.BlockSpec((tm, F), lambda i, h: (i, 0)),
        scratch_shapes=[pltpu.VMEM((tm, F), jnp.float32)],
        compiler_params=pltpu.CompilerParams(
            dimension_semantics=("parallel", "arbitrary"),
            vmem_limit_bytes=_VMEM_LIMIT),
    )(x.astype(jnp.bfloat16), w1, b1.reshape(1, H).astype(jnp.float32),
      w2, b2.reshape(1, F).astype(jnp.float32), res.astype(jnp.bfloat16),
      g.reshape(1, F).astype(jnp.float32), beta.reshape(1, F).astype(jnp.float32))


# ---------------------------------------------------------------------------
# flash attention: grid = (B, H, q_tiles, kv_tiles), online softmax,
# m/l/acc f32 VMEM scratch, per-head bf16 q/k/v blocks.  VMEM is O(tile).
# Used for both self- and cross-attention (no mask in the reference).
# ---------------------------------------------------------------------------
def _flash_attn_kernel(q_ref, k_ref, v_ref, o_ref, m_sc, l_sc, acc_sc, *, scale):
    ki = pl.program_id(3)

    @pl.when(ki == 0)
    def _():
        m_sc[...] = jnp.full(m_sc.shape, -jnp.inf, jnp.float32)
        l_sc[...] = jnp.zeros(l_sc.shape, jnp.float32)
        acc_sc[...] = jnp.zeros(acc_sc.shape, jnp.float32)

    q = q_ref[0, 0] * scale                 # (tq, hd) bf16, scale folded into q
    k = k_ref[0, 0]                         # (tkv, hd) bf16
    v = v_ref[0, 0]                         # (tkv, hd) bf16
    # scores = q @ k.T without materializing a transpose
    s = jax.lax.dot_general(q, k, (((1,), (1,)), ((), ())),
                            preferred_element_type=jnp.float32)   # (tq, tkv) f32

    m_prev = m_sc[...]
    m_new = jnp.maximum(m_prev, jnp.max(s, axis=-1, keepdims=True))
    alpha = jnp.exp(m_prev - m_new)
    p = jnp.exp(s - m_new)
    l_sc[...] = alpha * l_sc[...] + jnp.sum(p, axis=-1, keepdims=True)
    acc_sc[...] = alpha * acc_sc[...] + jnp.dot(p.astype(jnp.bfloat16), v,
                                                preferred_element_type=jnp.float32)
    m_sc[...] = m_new

    @pl.when(ki == pl.num_programs(3) - 1)
    def _():
        o_ref[0, 0] = (acc_sc[...] * pl.reciprocal(l_sc[...], approx=True)
                       ).astype(o_ref.dtype)


def pallas_flash_attention(q, k, v, tq=None, tkv=None):
    """q: (B,H,Sq,hd) bf16; k/v: (B,H,Skv,hd) bf16 -> (B,H,Sq,hd) bf16."""
    B, H, Sq, hd = q.shape
    Skv = k.shape[2]
    # KV tile >= 256 when possible so the MXU N side stays full (v6e/v7x).
    tq = _choose_tile(Sq, tq or 256, 8)
    tkv = _choose_tile(Skv, tkv or 512, 8)
    scale = 1.0 / (hd ** 0.5)

    return pl.pallas_call(
        partial(_flash_attn_kernel, scale=scale),
        out_shape=jax.ShapeDtypeStruct((B, H, Sq, hd), jnp.bfloat16),
        grid=(B, H, Sq // tq, Skv // tkv),
        in_specs=[
            pl.BlockSpec((1, 1, tq, hd), lambda b, h, qi, ki: (b, h, qi, 0)),
            pl.BlockSpec((1, 1, tkv, hd), lambda b, h, qi, ki: (b, h, ki, 0)),
            pl.BlockSpec((1, 1, tkv, hd), lambda b, h, qi, ki: (b, h, ki, 0)),
        ],
        out_specs=pl.BlockSpec((1, 1, tq, hd), lambda b, h, qi, ki: (b, h, qi, 0)),
        scratch_shapes=[pltpu.VMEM((tq, 1), jnp.float32),
                        pltpu.VMEM((tq, 1), jnp.float32),
                        pltpu.VMEM((tq, hd), jnp.float32)],
        compiler_params=pltpu.CompilerParams(
            dimension_semantics=("parallel", "parallel", "parallel", "arbitrary"),
            vmem_limit_bytes=_VMEM_LIMIT),
    )(q, k, v)


# ---------------------------------------------------------------------------
# parameter init (weights bf16 for MXU; biases / LN / embedding f32)
# ---------------------------------------------------------------------------
def _init_w(key, fan_in, fan_out):
    return (jax.random.normal(key, (fan_in, fan_out), jnp.float32) * 0.02).astype(jnp.bfloat16)


def _init_linear(key, fan_in, fan_out):
    return {"w": _init_w(key, fan_in, fan_out),
            "b": jnp.zeros((fan_out,), jnp.float32)}


def _init_ln(features):
    return {"g": jnp.ones((features,), jnp.float32),
            "b": jnp.zeros((features,), jnp.float32)}


def _init_self_mha(key, features):
    kqkv, ko = jax.random.split(key, 2)
    return {"wqkv": _init_w(kqkv, features, 3 * features),
            "bqkv": jnp.zeros((3 * features,), jnp.float32),
            "wo": _init_w(ko, features, features),
            "bo": jnp.zeros((features,), jnp.float32)}


def _init_cross_mha(key, features):
    kq, kkv, ko = jax.random.split(key, 3)
    return {"wq": _init_w(kq, features, features),
            "bq": jnp.zeros((features,), jnp.float32),
            "wkv": _init_w(kkv, features, 2 * features),
            "bkv": jnp.zeros((2 * features,), jnp.float32),
            "wo": _init_w(ko, features, features),
            "bo": jnp.zeros((features,), jnp.float32)}


def _init_encoder_block(key, features, mlp_factor):
    k1, k2, k3 = jax.random.split(key, 3)
    return {"attn": _init_self_mha(k1, features),
            "ln1": _init_ln(features),
            "fc1": _init_linear(k2, features, features * mlp_factor),
            "fc2": _init_linear(k3, features * mlp_factor, features),
            "ln2": _init_ln(features)}


def _init_decoder_block(key, features, mlp_factor):
    k1, k2, k3, k4 = jax.random.split(key, 4)
    return {"self_attn": _init_self_mha(k1, features),
            "ln1": _init_ln(features),
            "cross_attn": _init_cross_mha(k2, features),
            "ln2": _init_ln(features),
            "fc1": _init_linear(k3, features, features * mlp_factor),
            "fc2": _init_linear(k4, features * mlp_factor, features),
            "ln3": _init_ln(features)}


def init_transformer(key, features, vocab_size, mlp_factor=4, num_blocks=6):
    keys = jax.random.split(key, 2 * num_blocks + 2)
    return {
        "tokens": jax.random.normal(keys[0], (vocab_size, features), jnp.float32) * 0.02,
        "encoder": [_init_encoder_block(keys[1 + i], features, mlp_factor)
                    for i in range(num_blocks)],
        "decoder": [_init_decoder_block(keys[1 + num_blocks + i], features, mlp_factor)
                    for i in range(num_blocks)],
        "project": _init_linear(keys[-1], features, vocab_size),
    }


# ---------------------------------------------------------------------------
# forward pass (post-norm blocks, matching the reference Encoder/Decoder)
# ---------------------------------------------------------------------------
def _self_mha_sublayer(x, p, ln, num_heads):
    B, S, F = x.shape
    hd = F // num_heads
    x2d = x.reshape(B * S, F)
    qkv = pallas_linear(x2d, p["wqkv"], p["bqkv"])                 # (B*S, 3F) bf16
    # TODO(synk): the per-head layout shuffle below is a cheap bf16 XLA transpose;
    # it could be folded into the projection kernel's out_spec for 128-aligned heads.
    qkv = qkv.reshape(B, S, 3, num_heads, hd).transpose(2, 0, 3, 1, 4)  # (3,B,H,S,hd)
    attn = pallas_flash_attention(qkv[0], qkv[1], qkv[2])          # (B,H,S,hd) bf16
    attn2d = attn.transpose(0, 2, 1, 3).reshape(B * S, F)
    out = pallas_linear_res_ln(attn2d, p["wo"], p["bo"],
                               x2d, ln["g"], ln["b"])               # LN(x + wo(attn))
    return out.reshape(B, S, F)


def _cross_mha_sublayer(x_dec, x_enc, p, ln, num_heads):
    B, Sq, F = x_dec.shape
    Skv = x_enc.shape[1]
    hd = F // num_heads
    xq2d = x_dec.reshape(B * Sq, F)
    q = pallas_linear(xq2d, p["wq"], p["bq"])                       # (B*Sq, F) bf16
    kv = pallas_linear(x_enc.reshape(B * Skv, F), p["wkv"], p["bkv"])  # (B*Skv, 2F)
    q = q.reshape(B, Sq, num_heads, hd).transpose(0, 2, 1, 3)       # (B,H,Sq,hd)
    kv = kv.reshape(B, Skv, 2, num_heads, hd).transpose(2, 0, 3, 1, 4)  # (2,B,H,Skv,hd)
    attn = pallas_flash_attention(q, kv[0], kv[1])                  # (B,H,Sq,hd)
    attn2d = attn.transpose(0, 2, 1, 3).reshape(B * Sq, F)
    out = pallas_linear_res_ln(attn2d, p["wo"], p["bo"],
                               xq2d, ln["g"], ln["b"])
    return out.reshape(B, Sq, F)


def _mlp_sublayer(x, p, ln):
    B, S, F = x.shape
    x2d = x.reshape(B * S, F)
    out = pallas_mlp_res_ln(x2d, p["fc1"]["w"], p["fc1"]["b"],
                            p["fc2"]["w"], p["fc2"]["b"],
                            x2d, ln["g"], ln["b"])
    return out.reshape(B, S, F)


def _encoder_block(x, p, num_heads):
    x = _self_mha_sublayer(x, p["attn"], p["ln1"], num_heads)
    x = _mlp_sublayer(x, p, p["ln2"])
    return x


def _decoder_block(x, enc, p, num_heads):
    x = _self_mha_sublayer(x, p["self_attn"], p["ln1"], num_heads)
    x = _cross_mha_sublayer(x, enc, p["cross_attn"], p["ln2"], num_heads)
    x = _mlp_sublayer(x, p, p["ln3"])
    return x


def transformer_forward(params, x_encoder_ids, x_decoder_ids, num_heads):
    # TODO(synk): embedding gather kept in plain JAX (jnp.take); could be a DMA-gather kernel.
    x_enc = jnp.take(params["tokens"], x_encoder_ids, axis=0).astype(jnp.bfloat16)
    x_dec = jnp.take(params["tokens"], x_decoder_ids, axis=0).astype(jnp.bfloat16)
    for p in params["encoder"]:
        x_enc = _encoder_block(x_enc, p, num_heads)
    for p in params["decoder"]:
        x_dec = _decoder_block(x_dec, x_enc, p, num_heads)
    B, S, F = x_dec.shape
    out = pallas_linear(x_dec.reshape(B * S, F),
                        params["project"]["w"], params["project"]["b"],
                        out_dtype=jnp.float32)      # f32 logits, direct o_ref accumulation
    return out.reshape(B, S, -1)                    # (B, S_dec, vocab)


# ---------------------------------------------------------------------------
if __name__ == "__main__":
    features = 32
    vocab_size = 64
    mlp_factor = 4
    num_heads = 8
    num_blocks = 2
    batch = 2
    seq_enc = 8
    seq_dec = 8

    root = jax.random.PRNGKey(0)
    k_params, k_enc, k_dec = jax.random.split(root, 3)

    params = init_transformer(k_params, features, vocab_size,
                              mlp_factor=mlp_factor, num_blocks=num_blocks)

    x_encoder = jax.random.randint(k_enc, (batch, seq_enc), 0, vocab_size, jnp.int32)
    x_decoder = jax.random.randint(k_dec, (batch, seq_dec), 0, vocab_size, jnp.int32)

    fwd = jax.jit(partial(transformer_forward, num_heads=num_heads))
    out = fwd(params, x_encoder, x_decoder)
    out = jax.block_until_ready(out)

    assert out.shape == (batch, seq_dec, vocab_size)
    assert bool(jnp.all(jnp.isfinite(out)))
    print("KERNEL_OK")
</pallas_src>

<mosaic_0001>
module attributes {stable_mosaic.version = 11 : i64} {
  func.func @_linear_kernel(%arg0: i32, %arg1: i32, %arg2: i32, %arg3: memref<16x32xbf16, #tpu.memory_space<vmem>>, %arg4: memref<32x96xbf16, #tpu.memory_space<vmem>>, %arg5: memref<1x96xf32, #tpu.memory_space<vmem>>, %arg6: memref<16x96xbf16, #tpu.memory_space<vmem>>, %arg7: memref<16x96xf32, #tpu.memory_space<vmem>>) attributes {dimension_semantics = [#tpu.dimension_semantics<parallel>, #tpu.dimension_semantics<parallel>, #tpu.dimension_semantics<arbitrary>], iteration_bounds = array<i64: 1, 1, 1>, scalar_prefetch = 0 : i64, scratch_operands = 1 : i64, tpu.core_type = #tpu.core_type<tc>, window_params = [{transform_indices = @transform_0, window_bounds = array<i64: 16, 32>}, {transform_indices = @transform_1, window_bounds = array<i64: 32, 96>}, {transform_indices = @transform_2, window_bounds = array<i64: 1, 96>}, {transform_indices = @transform_3, window_bounds = array<i64: 16, 96>}]} {
    %c0_i32 = arith.constant 0 : i32
    %0 = arith.cmpi eq, %arg2, %c0_i32 : i32
    %1 = arith.extui %0 : i1 to i32
    %c0_i32_0 = arith.constant 0 : i32
    %2 = arith.cmpi ne, %1, %c0_i32_0 : i32
    scf.if %2 {
      %cst_10 = arith.constant 0.000000e+00 : f32
      %12 = vector.broadcast %cst_10 : f32 to vector<16x96xf32>
      %c0_11 = arith.constant 0 : index
      %c0_12 = arith.constant 0 : index
      %13 = vector.load %arg7[%c0_11, %c0_12] : memref<16x96xf32, #tpu.memory_space<vmem>>, vector<16x96xf32>
      tpu.vector_store %arg7[%c0_11, %c0_12], %12 {strides = array<i32>} : memref<16x96xf32, #tpu.memory_space<vmem>>, vector<16x96xf32>,
    } else {
    }
    %c0 = arith.constant 0 : index
    %c0_1 = arith.constant 0 : index
    %3 = vector.load %arg7[%c0, %c0_1] : memref<16x96xf32, #tpu.memory_space<vmem>>, vector<16x96xf32>
    %c0_2 = arith.constant 0 : index
    %c0_3 = arith.constant 0 : index
    %4 = vector.load %arg3[%c0_2, %c0_3] : memref<16x32xbf16, #tpu.memory_space<vmem>>, vector<16x32xbf16>
    %c0_4 = arith.constant 0 : index
    %c0_5 = arith.constant 0 : index
    %5 = vector.load %arg4[%c0_4, %c0_5] : memref<32x96xbf16, #tpu.memory_space<vmem>>, vector<32x96xbf16>
    %cst = arith.constant dense<0.000000e+00> : vector<16x96xf32>
    %6 = tpu.matmul %4, %5, %cst {dimension_numbers = #tpu.dot_dimension_numbers<[1], [0], [0], [1], [0, 0, 1, 1], [], []>} : vector<16x32xbf16>, vector<32x96xbf16>, vector<16x96xf32> -> vector<16x96xf32>
    %7 = arith.addf %3, %6 : vector<16x96xf32>
    %c0_6 = arith.constant 0 : index
    %c0_7 = arith.constant 0 : index
    %8 = vector.load %arg7[%c0_6, %c0_7] : memref<16x96xf32, #tpu.memory_space<vmem>>, vector<16x96xf32>
    tpu.vector_store %arg7[%c0_6, %c0_7], %7 {strides = array<i32>} : memref<16x96xf32, #tpu.memory_space<vmem>>, vector<16x96xf32>,
    %c0_i32_8 = arith.constant 0 : i32
    %9 = arith.cmpi eq, %arg2, %c0_i32_8 : i32
    %10 = arith.extui %9 : i1 to i32
    %c0_i32_9 = arith.constant 0 : i32
    %11 = arith.cmpi ne, %10, %c0_i32_9 : i32
    scf.if %11 {
      %c0_10 = arith.constant 0 : index
      %c0_11 = arith.constant 0 : index
      %12 = vector.load %arg7[%c0_10, %c0_11] : memref<16x96xf32, #tpu.memory_space<vmem>>, vector<16x96xf32>
      %c0_12 = arith.constant 0 : index
      %c0_13 = arith.constant 0 : index
      %13 = vector.load %arg5[%c0_12, %c0_13] : memref<1x96xf32, #tpu.memory_space<vmem>>, vector<1x96xf32>
      %14 = vector.broadcast %13 : vector<1x96xf32> to vector<16x96xf32>
      %15 = arith.addf %12, %14 : vector<16x96xf32>
      %16 = arith.truncf %15 : vector<16x96xf32> to vector<16x96xbf16>
      %c0_14 = arith.constant 0 : index
      %c0_15 = arith.constant 0 : index
      %17 = vector.load %arg6[%c0_14, %c0_15] : memref<16x96xbf16, #tpu.memory_space<vmem>>, vector<16x96xbf16>
      tpu.vector_store %arg6[%c0_14, %c0_15], %16 {strides = array<i32>} : memref<16x96xbf16, #tpu.memory_space<vmem>>, vector<16x96xbf16>,
    } else {
    }
    return
  }
  func.func @transform_0(%arg0: i32, %arg1: i32, %arg2: i32) -> (i32, i32) {
    %c0_i32 = arith.constant 0 : i32
    return %arg0, %arg2 : i32, i32
  }
  func.func @transform_1(%arg0: i32, %arg1: i32, %arg2: i32) -> (i32, i32) {
    %c0_i32 = arith.constant 0 : i32
    return %arg2, %arg1 : i32, i32
  }
  func.func @transform_2(%arg0: i32, %arg1: i32, %arg2: i32) -> (i32, i32) {
    %c0_i32 = arith.constant 0 : i32
    %c0_i32_0 = arith.constant 0 : i32
    return %c0_i32, %arg1 : i32, i32
  }
  func.func @transform_3(%arg0: i32, %arg1: i32, %arg2: i32) -> (i32, i32) {
    %c0_i32 = arith.constant 0 : i32
    return %arg0, %arg1 : i32, i32
  }
}

module attributes {stable_mosaic.version = 11 : i64} {
  func.func @_flash_attn_kernel(%arg0: i32, %arg1: i32, %arg2: i32, %arg3: i32, %arg4: memref<1x1x8x4xbf16, #tpu.memory_space<vmem>>, %arg5: memref<1x1x8x4xbf16, #tpu.memory_space<vmem>>, %arg6: memref<1x1x8x4xbf16, #tpu.memory_space<vmem>>, %arg7: memref<1x1x8x4xbf16, #tpu.memory_space<vmem>>, %arg8: memref<8x1xf32, #tpu.memory_space<vmem>>, %arg9: memref<8x1xf32, #tpu.memory_space<vmem>>, %arg10: memref<8x4xf32, #tpu.memory_space<vmem>>) attributes {dimension_semantics = [#tpu.dimension_semantics<parallel>, #tpu.dimension_semantics<parallel>, #tpu.dimension_semantics<parallel>, #tpu.dimension_semantics<arbitrary>], iteration_bounds = array<i64: 2, 8, 1, 1>, scalar_prefetch = 0 : i64, scratch_operands = 3 : i64, tpu.core_type = #tpu.core_type<tc>, window_params = [{transform_indices = @transform_0, window_bounds = array<i64: 1, 1, 8, 4>}, {transform_indices = @transform_1, window_bounds = array<i64: 1, 1, 8, 4>}, {transform_indices = @transform_2, window_bounds = array<i64: 1, 1, 8, 4>}, {transform_indices = @transform_3, window_bounds = array<i64: 1, 1, 8, 4>}]} {
    %c0_i32 = arith.constant 0 : i32
    %0 = arith.cmpi eq, %arg3, %c0_i32 : i32
    %1 = arith.extui %0 : i1 to i32
    %c0_i32_0 = arith.constant 0 : i32
    %2 = arith.cmpi ne, %1, %c0_i32_0 : i32
    scf.if %2 {
      %cst_30 = arith.constant 0xFF800000 : f32
      %38 = vector.broadcast %cst_30 : f32 to vector<8x1xf32>
      %c0_31 = arith.constant 0 : index
      %c0_32 = arith.constant 0 : index
      %39 = vector.load %arg8[%c0_31, %c0_32] : memref<8x1xf32, #tpu.memory_space<vmem>>, vector<8x1xf32>
      tpu.vector_store %arg8[%c0_31, %c0_32], %38 {strides = array<i32>} : memref<8x1xf32, #tpu.memory_space<vmem>>, vector<8x1xf32>,
      %cst_33 = arith.constant 0.000000e+00 : f32
      %40 = vector.broadcast %cst_33 : f32 to vector<8x1xf32>
      %c0_34 = arith.constant 0 : index
      %c0_35 = arith.constant 0 : index
      %41 = vector.load %arg9[%c0_34, %c0_35] : memref<8x1xf32, #tpu.memory_space<vmem>>, vector<8x1xf32>
      tpu.vector_store %arg9[%c0_34, %c0_35], %40 {strides = array<i32>} : memref<8x1xf32, #tpu.memory_space<vmem>>, vector<8x1xf32>,
      %cst_36 = arith.constant 0.000000e+00 : f32
      %42 = vector.broadcast %cst_36 : f32 to vector<8x4xf32>
      %c0_37 = arith.constant 0 : index
      %c0_38 = arith.constant 0 : index
      %43 = vector.load %arg10[%c0_37, %c0_38] : memref<8x4xf32, #tpu.memory_space<vmem>>, vector<8x4xf32>
      tpu.vector_store %arg10[%c0_37, %c0_38], %42 {strides = array<i32>} : memref<8x4xf32, #tpu.memory_space<vmem>>, vector<8x4xf32>,
    } else {
    }
    %c0 = arith.constant 0 : index
    %c0_1 = arith.constant 0 : index
    %c0_2 = arith.constant 0 : index
    %c0_3 = arith.constant 0 : index
    %3 = vector.load %arg4[%c0, %c0_1, %c0_2, %c0_3] : memref<1x1x8x4xbf16, #tpu.memory_space<vmem>>, vector<1x1x8x4xbf16>
    %4 = vector.shape_cast %3 : vector<1x1x8x4xbf16> to vector<8x4xbf16>
    %cst = arith.constant 5.000000e-01 : bf16
    %5 = vector.broadcast %cst : bf16 to vector<8x4xbf16>
    %6 = arith.mulf %4, %5 : vector<8x4xbf16>
    %c0_4 = arith.constant 0 : index
    %c0_5 = arith.constant 0 : index
    %c0_6 = arith.constant 0 : index
    %c0_7 = arith.constant 0 : index
    %7 = vector.load %arg5[%c0_4, %c0_5, %c0_6, %c0_7] : memref<1x1x8x4xbf16, #tpu.memory_space<vmem>>, vector<1x1x8x4xbf16>
    %8 = vector.shape_cast %7 : vector<1x1x8x4xbf16> to vector<8x4xbf16>
    %c0_8 = arith.constant 0 : index
    %c0_9 = arith.constant 0 : index
    %c0_10 = arith.constant 0 : index
    %c0_11 = arith.constant 0 : index
    %9 = vector.load %arg6[%c0_8, %c0_9, %c0_10, %c0_11] : memref<1x1x8x4xbf16, #tpu.memory_space<vmem>>, vector<1x1x8x4xbf16>
    %10 = vector.shape_cast %9 : vector<1x1x8x4xbf16> to vector<8x4xbf16>
    %cst_12 = arith.constant dense<0.000000e+00> : vector<8x8xf32>
    %11 = tpu.matmul %6, %8, %cst_12 {dimension_numbers = #tpu.dot_dimension_numbers<[1], [1], [0], [0], [0, 0, 1, 0], [], []>} : vector<8x4xbf16>, vector<8x4xbf16>, vector<8x8xf32> -> vector<8x8xf32>
    %c0_13 = arith.constant 0 : index
    %c0_14 = arith.constant 0 : index
    %12 = vector.load %arg8[%c0_13, %c0_14] : memref<8x1xf32, #tpu.memory_space<vmem>>, vector<8x1xf32>
    %cst_15 = arith.constant dense<0xFF800000> : vector<8xf32>
    %13 = vector.multi_reduction <maximumf>, %11, %cst_15 [1] : vector<8x8xf32> to vector<8xf32>
    %14 = vector.shape_cast %13 : vector<8xf32> to vector<8x1xf32>
    %15 = arith.maximumf %12, %14 : vector<8x1xf32>
    %16 = arith.subf %12, %15 : vector<8x1xf32>
    %17 = math.exp %16 : vector<8x1xf32>
    %18 = vector.broadcast %15 : vector<8x1xf32> to vector<8x8xf32>
    %19 = arith.subf %11, %18 : vector<8x8xf32>
    %20 = math.exp %19 : vector<8x8xf32>
    %c0_16 = arith.constant 0 : index
    %c0_17 = arith.constant 0 : index
    %21 = vector.load %arg9[%c0_16, %c0_17] : memref<8x1xf32, #tpu.memory_space<vmem>>, vector<8x1xf32>
    %22 = arith.mulf %17, %21 : vector<8x1xf32>
    %cst_18 = arith.constant dense<0.000000e+00> : vector<8xf32>
    %23 = vector.multi_reduction <add>, %20, %cst_18 [1] : vector<8x8xf32> to vector<8xf32>
    %24 = vector.shape_cast %23 : vector<8xf32> to vector<8x1xf32>
    %25 = arith.addf %22, %24 : vector<8x1xf32>
    %c0_19 = arith.constant 0 : index
    %c0_20 = arith.constant 0 : index
    %26 = vector.load %arg9[%c0_19, %c0_20] : memref<8x1xf32, #tpu.memory_space<vmem>>, vector<8x1xf32>
    tpu.vector_store %arg9[%c0_19, %c0_20], %25 {strides = array<i32>} : memref<8x1xf32, #tpu.memory_space<vmem>>, vector<8x1xf32>,
    %c0_21 = arith.constant 0 : index
    %c0_22 = arith.constant 0 : index
    %27 = vector.load %arg10[%c0_21, %c0_22] : memref<8x4xf32, #tpu.memory_space<vmem>>, vector<8x4xf32>
    %28 = vector.broadcast %17 : vector<8x1xf32> to vector<8x4xf32>
    %29 = arith.mulf %28, %27 : vector<8x4xf32>
    %30 = arith.truncf %20 : vector<8x8xf32> to vector<8x8xbf16>
    %cst_23 = arith.constant dense<0.000000e+00> : vector<8x4xf32>
    %31 = tpu.matmul %30, %10, %cst_23 {dimension_numbers = #tpu.dot_dimension_numbers<[1], [0], [0], [1], [0, 0, 1, 1], [], []>} : vector<8x8xbf16>, vector<8x4xbf16>, vector<8x4xf32> -> vector<8x4xf32>
    %32 = arith.addf %29, %31 : vector<8x4xf32>
    %c0_24 = arith.constant 0 : index
    %c0_25 = arith.constant 0 : index
    %33 = vector.load %arg10[%c0_24, %c0_25] : memref<8x4xf32, #tpu.memory_space<vmem>>, vector<8x4xf32>
    tpu.vector_store %arg10[%c0_24, %c0_25], %32 {strides = array<i32>} : memref<8x4xf32, #tpu.memory_space<vmem>>, vector<8x4xf32>,
    %c0_26 = arith.constant 0 : index
    %c0_27 = arith.constant 0 : index
    %34 = vector.load %arg8[%c0_26, %c0_27] : memref<8x1xf32, #tpu.memory_space<vmem>>, vector<8x1xf32>
    tpu.vector_store %arg8[%c0_26, %c0_27], %15 {strides = array<i32>} : memref<8x1xf32, #tpu.memory_space<vmem>>, vector<8x1xf32>,
    %c0_i32_28 = arith.constant 0 : i32
    %35 = arith.cmpi eq, %arg3, %c0_i32_28 : i32
    %36 = arith.extui %35 : i1 to i32
    %c0_i32_29 = arith.constant 0 : i32
    %37 = arith.cmpi ne, %36, %c0_i32_29 : i32
    scf.if %37 {
      %c0_30 = arith.constant 0 : index
      %c0_31 = arith.constant 0 : index
      %38 = vector.load %arg10[%c0_30, %c0_31] : memref<8x4xf32, #tpu.memory_space<vmem>>, vector<8x4xf32>
      %c0_32 = arith.constant 0 : index
      %c0_33 = arith.constant 0 : index
      %39 = vector.load %arg9[%c0_32, %c0_33] : memref<8x1xf32, #tpu.memory_space<vmem>>, vector<8x1xf32>
      %40 = tpu.reciprocal %39 {approx = true} : vector<8x1xf32> -> vector<8x1xf32>
      %41 = vector.broadcast %40 : vector<8x1xf32> to vector<8x4xf32>
      %42 = arith.mulf %38, %41 : vector<8x4xf32>
      %43 = arith.truncf %42 : vector<8x4xf32> to vector<8x4xbf16>
      %c0_34 = arith.constant 0 : index
      %c0_35 = arith.constant 0 : index
      %c0_36 = arith.constant 0 : index
      %c0_37 = arith.constant 0 : index
      %44 = vector.load %arg7[%c0_34, %c0_35, %c0_36, %c0_37] : memref<1x1x8x4xbf16, #tpu.memory_space<vmem>>, vector<1x1x8x4xbf16>
      %45 = vector.shape_cast %44 : vector<1x1x8x4xbf16> to vector<8x4xbf16>
      %46 = vector.shape_cast %43 : vector<8x4xbf16> to vector<1x1x8x4xbf16>
      tpu.vector_store %arg7[%c0_34, %c0_35, %c0_36, %c0_37], %46 {strides = array<i32>} : memref<1x1x8x4xbf16, #tpu.memory_space<vmem>>, vector<1x1x8x4xbf16>,
    } else {
    }
    return
  }
  func.func @transform_0(%arg0: i32, %arg1: i32, %arg2: i32, %arg3: i32) -> (i32, i32, i32, i32) {
    %c0_i32 = arith.constant 0 : i32
    %c0_i32_0 = arith.constant 0 : i32
    return %arg0, %arg1, %arg2, %c0_i32 : i32, i32, i32, i32
  }
  func.func @transform_1(%arg0: i32, %arg1: i32, %arg2: i32, %arg3: i32) -> (i32, i32, i32, i32) {
    %c0_i32 = arith.constant 0 : i32
    %c0_i32_0 = arith.constant 0 : i32
    return %arg0, %arg1, %arg3, %c0_i32 : i32, i32, i32, i32
  }
  func.func @transform_2(%arg0: i32, %arg1: i32, %arg2: i32, %arg3: i32) -> (i32, i32, i32, i32) {
    %c0_i32 = arith.constant 0 : i32
    %c0_i32_0 = arith.constant 0 : i32
    return %arg0, %arg1, %arg3, %c0_i32 : i32, i32, i32, i32
  }
  func.func @transform_3(%arg0: i32, %arg1: i32, %arg2: i32, %arg3: i32) -> (i32, i32, i32, i32) {
    %c0_i32 = arith.constant 0 : i32
    %c0_i32_0 = arith.constant 0 : i32
    return %arg0, %arg1, %arg2, %c0_i32 : i32, i32, i32, i32
  }
}

module attributes {stable_mosaic.version = 11 : i64} {
  func.func @_linear_res_ln_kernel(%arg0: i32, %arg1: i32, %arg2: memref<16x32xbf16, #tpu.memory_space<vmem>>, %arg3: memref<32x32xbf16, #tpu.memory_space<vmem>>, %arg4: memref<1x32xf32, #tpu.memory_space<vmem>>, %arg5: memref<16x32xbf16, #tpu.memory_space<vmem>>, %arg6: memref<1x32xf32, #tpu.memory_space<vmem>>, %arg7: memref<1x32xf32, #tpu.memory_space<vmem>>, %arg8: memref<16x32xbf16, #tpu.memory_space<vmem>>, %arg9: memref<16x32xf32, #tpu.memory_space<vmem>>) attributes {dimension_semantics = [#tpu.dimension_semantics<parallel>, #tpu.dimension_semantics<arbitrary>], iteration_bounds = array<i64: 1, 1>, scalar_prefetch = 0 : i64, scratch_operands = 1 : i64, tpu.core_type = #tpu.core_type<tc>, window_params = [{transform_indices = @transform_0, window_bounds = array<i64: 16, 32>}, {transform_indices = @transform_1, window_bounds = array<i64: 32, 32>}, {pipeline_mode = #tpu.pipeline_mode<synchronous>, transform_indices = @transform_2, window_bounds = array<i64: 1, 32>}, {transform_indices = @transform_3, window_bounds = array<i64: 16, 32>}, {pipeline_mode = #tpu.pipeline_mode<synchronous>, transform_indices = @transform_4, window_bounds = array<i64: 1, 32>}, {pipeline_mode = #tpu.pipeline_mode<synchronous>, transform_indices = @transform_5, window_bounds = array<i64: 1, 32>}, {transform_indices = @transform_6, window_bounds = array<i64: 16, 32>}]} {
    %c0_i32 = arith.constant 0 : i32
    %0 = arith.cmpi eq, %arg1, %c0_i32 : i32
    %1 = arith.extui %0 : i1 to i32
    %c0_i32_0 = arith.constant 0 : i32
    %2 = arith.cmpi ne, %1, %c0_i32_0 : i32
    scf.if %2 {
      %cst_10 = arith.constant 0.000000e+00 : f32
      %12 = vector.broadcast %cst_10 : f32 to vector<16x32xf32>
      %c0_11 = arith.constant 0 : index
      %c0_12 = arith.constant 0 : index
      %13 = vector.load %arg9[%c0_11, %c0_12] : memref<16x32xf32, #tpu.memory_space<vmem>>, vector<16x32xf32>
      tpu.vector_store %arg9[%c0_11, %c0_12], %12 {strides = array<i32>} : memref<16x32xf32, #tpu.memory_space<vmem>>, vector<16x32xf32>,
    } else {
    }
    %c0 = arith.constant 0 : index
    %c0_1 = arith.constant 0 : index
    %3 = vector.load %arg9[%c0, %c0_1] : memref<16x32xf32, #tpu.memory_space<vmem>>, vector<16x32xf32>
    %c0_2 = arith.constant 0 : index
    %c0_3 = arith.constant 0 : index
    %4 = vector.load %arg2[%c0_2, %c0_3] : memref<16x32xbf16, #tpu.memory_space<vmem>>, vector<16x32xbf16>
    %c0_4 = arith.constant 0 : index
    %c0_5 = arith.constant 0 : index
    %5 = vector.load %arg3[%c0_4, %c0_5] : memref<32x32xbf16, #tpu.memory_space<vmem>>, vector<32x32xbf16>
    %cst = arith.constant dense<0.000000e+00> : vector<16x32xf32>
    %6 = tpu.matmul %4, %5, %cst {dimension_numbers = #tpu.dot_dimension_numbers<[1], [0], [0], [1], [0, 0, 1, 1], [], []>} : vector<16x32xbf16>, vector<32x32xbf16>, vector<16x32xf32> -> vector<16x32xf32>
    %7 = arith.addf %3, %6 : vector<16x32xf32>
    %c0_6 = arith.constant 0 : index
    %c0_7 = arith.constant 0 : index
    %8 = vector.load %arg9[%c0_6, %c0_7] : memref<16x32xf32, #tpu.memory_space<vmem>>, vector<16x32xf32>
    tpu.vector_store %arg9[%c0_6, %c0_7], %7 {strides = array<i32>} : memref<16x32xf32, #tpu.memory_space<vmem>>, vector<16x32xf32>,
    %c0_i32_8 = arith.constant 0 : i32
    %9 = arith.cmpi eq, %arg1, %c0_i32_8 : i32
    %10 = arith.extui %9 : i1 to i32
    %c0_i32_9 = arith.constant 0 : i32
    %11 = arith.cmpi ne, %10, %c0_i32_9 : i32
    scf.if %11 {
      %c0_10 = arith.constant 0 : index
      %c0_11 = arith.constant 0 : index
      %12 = vector.load %arg9[%c0_10, %c0_11] : memref<16x32xf32, #tpu.memory_space<vmem>>, vector<16x32xf32>
      %c0_12 = arith.constant 0 : index
      %c0_13 = arith.constant 0 : index
      %13 = vector.load %arg4[%c0_12, %c0_13] : memref<1x32xf32, #tpu.memory_space<vmem>>, vector<1x32xf32>
      %14 = vector.broadcast %13 : vector<1x32xf32> to vector<16x32xf32>
      %15 = arith.addf %12, %14 : vector<16x32xf32>
      %c0_14 = arith.constant 0 : index
      %c0_15 = arith.constant 0 : index
      %16 = vector.load %arg5[%c0_14, %c0_15] : memref<16x32xbf16, #tpu.memory_space<vmem>>, vector<16x32xbf16>
      %17 = arith.extf %16 : vector<16x32xbf16> to vector<16x32xf32>
      %18 = arith.addf %15, %17 : vector<16x32xf32>
      %c0_16 = arith.constant 0 : index
      %c0_17 = arith.constant 0 : index
      %19 = vector.load %arg6[%c0_16, %c0_17] : memref<1x32xf32, #tpu.memory_space<vmem>>, vector<1x32xf32>
      %c0_18 = arith.constant 0 : index
      %c0_19 = arith.constant 0 : index
      %20 = vector.load %arg7[%c0_18, %c0_19] : memref<1x32xf32, #tpu.memory_space<vmem>>, vector<1x32xf32>
      %cst_20 = arith.constant dense<0.000000e+00> : vector<16xf32>
      %21 = vector.multi_reduction <add>, %18, %cst_20 [1] : vector<16x32xf32> to vector<16xf32>
      %22 = vector.shape_cast %21 : vector<16xf32> to vector<16x1xf32>
      %cst_21 = arith.constant 3.200000e+01 : f32
      %23 = vector.broadcast %cst_21 : f32 to vector<16x1xf32>
      %24 = arith.divf %22, %23 : vector<16x1xf32>
      %25 = vector.broadcast %24 : vector<16x1xf32> to vector<16x32xf32>
      %26 = arith.subf %18, %25 : vector<16x32xf32>
      %27 = arith.mulf %26, %26 : vector<16x32xf32>
      %cst_22 = arith.constant dense<0.000000e+00> : vector<16xf32>
      %28 = vector.multi_reduction <add>, %27, %cst_22 [1] : vector<16x32xf32> to vector<16xf32>
      %29 = vector.shape_cast %28 : vector<16xf32> to vector<16x1xf32>
      %cst_23 = arith.constant 3.200000e+01 : f32
      %30 = vector.broadcast %cst_23 : f32 to vector<16x1xf32>
      %31 = arith.divf %29, %30 : vector<16x1xf32>
      %cst_24 = arith.constant 9.99999974E-6 : f32
      %32 = vector.broadcast %cst_24 : f32 to vector<16x1xf32>
      %33 = arith.addf %31, %32 : vector<16x1xf32>
      %34 = math.rsqrt %33 : vector<16x1xf32>
      %35 = vector.broadcast %34 : vector<16x1xf32> to vector<16x32xf32>
      %36 = arith.mulf %26, %35 : vector<16x32xf32>
      %37 = vector.broadcast %19 : vector<1x32xf32> to vector<16x32xf32>
      %38 = arith.mulf %36, %37 : vector<16x32xf32>
      %39 = vector.broadcast %20 : vector<1x32xf32> to vector<16x32xf32>
      %40 = arith.addf %38, %39 : vector<16x32xf32>
      %41 = arith.truncf %40 : vector<16x32xf32> to vector<16x32xbf16>
      %c0_25 = arith.constant 0 : index
      %c0_26 = arith.constant 0 : index
      %42 = vector.load %arg8[%c0_25, %c0_26] : memref<16x32xbf16, #tpu.memory_space<vmem>>, vector<16x32xbf16>
      tpu.vector_store %arg8[%c0_25, %c0_26], %41 {strides = array<i32>} : memref<16x32xbf16, #tpu.memory_space<vmem>>, vector<16x32xbf16>,
    } else {
    }
    return
  }
  func.func @transform_0(%arg0: i32, %arg1: i32) -> (i32, i32) {
    %c0_i32 = arith.constant 0 : i32
    return %arg0, %arg1 : i32, i32
  }
  func.func @transform_1(%arg0: i32, %arg1: i32) -> (i32, i32) {
    %c0_i32 = arith.constant 0 : i32
    %c0_i32_0 = arith.constant 0 : i32
    return %arg1, %c0_i32 : i32, i32
  }
  func.func @transform_2(%arg0: i32, %arg1: i32) -> (i32, i32) {
    %c0_i32 = arith.constant 0 : i32
    %c0_i32_0 = arith.constant 0 : i32
    %c0_i32_1 = arith.constant 0 : i32
    return %c0_i32, %c0_i32_0 : i32, i32
  }
  func.func @transform_3(%arg0: i32, %arg1: i32) -> (i32, i32) {
    %c0_i32 = arith.constant 0 : i32
    %c0_i32_0 = arith.constant 0 : i32
    return %arg0, %c0_i32 : i32, i32
  }
  func.func @transform_4(%arg0: i32, %arg1: i32) -> (i32, i32) {
    %c0_i32 = arith.constant 0 : i32
    %c0_i32_0 = arith.constant 0 : i32
    %c0_i32_1 = arith.constant 0 : i32
    return %c0_i32, %c0_i32_0 : i32, i32
  }
  func.func @transform_5(%arg0: i32, %arg1: i32) -> (i32, i32) {
    %c0_i32 = arith.constant 0 : i32
    %c0_i32_0 = arith.constant 0 : i32
    %c0_i32_1 = arith.constant 0 : i32
    return %c0_i32, %c0_i32_0 : i32, i32
  }
  func.func @transform_6(%arg0: i32, %arg1: i32) -> (i32, i32) {
    %c0_i32 = arith.constant 0 : i32
    %c0_i32_0 = arith.constant 0 : i32
    return %arg0, %c0_i32 : i32, i32
  }
}

module attributes {stable_mosaic.version = 11 : i64} {
  func.func @_linear_kernel(%arg0: i32, %arg1: i32, %arg2: i32, %arg3: memref<16x32xbf16, #tpu.memory_space<vmem>>, %arg4: memref<32x32xbf16, #tpu.memory_space<vmem>>, %arg5: memref<1x32xf32, #tpu.memory_space<vmem>>, %arg6: memref<16x32xbf16, #tpu.memory_space<vmem>>, %arg7: memref<16x32xf32, #tpu.memory_space<vmem>>) attributes {dimension_semantics = [#tpu.dimension_semantics<parallel>, #tpu.dimension_semantics<parallel>, #tpu.dimension_semantics<arbitrary>], iteration_bounds = array<i64: 1, 1, 1>, scalar_prefetch = 0 : i64, scratch_operands = 1 : i64, tpu.core_type = #tpu.core_type<tc>, window_params = [{transform_indices = @transform_0, window_bounds = array<i64: 16, 32>}, {transform_indices = @transform_1, window_bounds = array<i64: 32, 32>}, {transform_indices = @transform_2, window_bounds = array<i64: 1, 32>}, {transform_indices = @transform_3, window_bounds = array<i64: 16, 32>}]} {
    %c0_i32 = arith.constant 0 : i32
    %0 = arith.cmpi eq, %arg2, %c0_i32 : i32
    %1 = arith.extui %0 : i1 to i32
    %c0_i32_0 = arith.constant 0 : i32
    %2 = arith.cmpi ne, %1, %c0_i32_0 : i32
    scf.if %2 {
      %cst_10 = arith.constant 0.000000e+00 : f32
      %12 = vector.broadcast %cst_10 : f32 to vector<16x32xf32>
      %c0_11 = arith.constant 0 : index
      %c0_12 = arith.constant 0 : index
      %13 = vector.load %arg7[%c0_11, %c0_12] : memref<16x32xf32, #tpu.memory_space<vmem>>, vector<16x32xf32>
      tpu.vector_store %arg7[%c0_11, %c0_12], %12 {strides = array<i32>} : memref<16x32xf32, #tpu.memory_space<vmem>>, vector<16x32xf32>,
    } else {
    }
    %c0 = arith.constant 0 : index
    %c0_1 = arith.constant 0 : index
    %3 = vector.load %arg7[%c0, %c0_1] : memref<16x32xf32, #tpu.memory_space<vmem>>, vector<16x32xf32>
    %c0_2 = arith.constant 0 : index
    %c0_3 = arith.constant 0 : index
    %4 = vector.load %arg3[%c0_2, %c0_3] : memref<16x32xbf16, #tpu.memory_space<vmem>>, vector<16x32xbf16>
    %c0_4 = arith.constant 0 : index
    %c0_5 = arith.constant 0 : index
    %5 = vector.load %arg4[%c0_4, %c0_5] : memref<32x32xbf16, #tpu.memory_space<vmem>>, vector<32x32xbf16>
    %cst = arith.constant dense<0.000000e+00> : vector<16x32xf32>
    %6 = tpu.matmul %4, %5, %cst {dimension_numbers = #tpu.dot_dimension_numbers<[1], [0], [0], [1], [0, 0, 1, 1], [], []>} : vector<16x32xbf16>, vector<32x32xbf16>, vector<16x32xf32> -> vector<16x32xf32>
    %7 = arith.addf %3, %6 : vector<16x32xf32>
    %c0_6 = arith.constant 0 : index
    %c0_7 = arith.constant 0 : index
    %8 = vector.load %arg7[%c0_6, %c0_7] : memref<16x32xf32, #tpu.memory_space<vmem>>, vector<16x32xf32>
    tpu.vector_store %arg7[%c0_6, %c0_7], %7 {strides = array<i32>} : memref<16x32xf32, #tpu.memory_space<vmem>>, vector<16x32xf32>,
    %c0_i32_8 = arith.constant 0 : i32
    %9 = arith.cmpi eq, %arg2, %c0_i32_8 : i32
    %10 = arith.extui %9 : i1 to i32
    %c0_i32_9 = arith.constant 0 : i32
    %11 = arith.cmpi ne, %10, %c0_i32_9 : i32
    scf.if %11 {
      %c0_10 = arith.constant 0 : index
      %c0_11 = arith.constant 0 : index
      %12 = vector.load %arg7[%c0_10, %c0_11] : memref<16x32xf32, #tpu.memory_space<vmem>>, vector<16x32xf32>
      %c0_12 = arith.constant 0 : index
      %c0_13 = arith.constant 0 : index
      %13 = vector.load %arg5[%c0_12, %c0_13] : memref<1x32xf32, #tpu.memory_space<vmem>>, vector<1x32xf32>
      %14 = vector.broadcast %13 : vector<1x32xf32> to vector<16x32xf32>
      %15 = arith.addf %12, %14 : vector<16x32xf32>
      %16 = arith.truncf %15 : vector<16x32xf32> to vector<16x32xbf16>
      %c0_14 = arith.constant 0 : index
      %c0_15 = arith.constant 0 : index
      %17 = vector.load %arg6[%c0_14, %c0_15] : memref<16x32xbf16, #tpu.memory_space<vmem>>, vector<16x32xbf16>
      tpu.vector_store %arg6[%c0_14, %c0_15], %16 {strides = array<i32>} : memref<16x32xbf16, #tpu.memory_space<vmem>>, vector<16x32xbf16>,
    } else {
    }
    return
  }
  func.func @transform_0(%arg0: i32, %arg1: i32, %arg2: i32) -> (i32, i32) {
    %c0_i32 = arith.constant 0 : i32
    return %arg0, %arg2 : i32, i32
  }
  func.func @transform_1(%arg0: i32, %arg1: i32, %arg2: i32) -> (i32, i32) {
    %c0_i32 = arith.constant 0 : i32
    return %arg2, %arg1 : i32, i32
  }
  func.func @transform_2(%arg0: i32, %arg1: i32, %arg2: i32) -> (i32, i32) {
    %c0_i32 = arith.constant 0 : i32
    %c0_i32_0 = arith.constant 0 : i32
    return %c0_i32, %arg1 : i32, i32
  }
  func.func @transform_3(%arg0: i32, %arg1: i32, %arg2: i32) -> (i32, i32) {
    %c0_i32 = arith.constant 0 : i32
    return %arg0, %arg1 : i32, i32
  }
}

module attributes {stable_mosaic.version = 11 : i64} {
  func.func @_linear_kernel(%arg0: i32, %arg1: i32, %arg2: i32, %arg3: memref<16x32xbf16, #tpu.memory_space<vmem>>, %arg4: memref<32x64xbf16, #tpu.memory_space<vmem>>, %arg5: memref<1x64xf32, #tpu.memory_space<vmem>>, %arg6: memref<16x64xbf16, #tpu.memory_space<vmem>>, %arg7: memref<16x64xf32, #tpu.memory_space<vmem>>) attributes {dimension_semantics = [#tpu.dimension_semantics<parallel>, #tpu.dimension_semantics<parallel>, #tpu.dimension_semantics<arbitrary>], iteration_bounds = array<i64: 1, 1, 1>, scalar_prefetch = 0 : i64, scratch_operands = 1 : i64, tpu.core_type = #tpu.core_type<tc>, window_params = [{transform_indices = @transform_0, window_bounds = array<i64: 16, 32>}, {transform_indices = @transform_1, window_bounds = array<i64: 32, 64>}, {transform_indices = @transform_2, window_bounds = array<i64: 1, 64>}, {transform_indices = @transform_3, window_bounds = array<i64: 16, 64>}]} {
    %c0_i32 = arith.constant 0 : i32
    %0 = arith.cmpi eq, %arg2, %c0_i32 : i32
    %1 = arith.extui %0 : i1 to i32
    %c0_i32_0 = arith.constant 0 : i32
    %2 = arith.cmpi ne, %1, %c0_i32_0 : i32
    scf.if %2 {
      %cst_10 = arith.constant 0.000000e+00 : f32
      %12 = vector.broadcast %cst_10 : f32 to vector<16x64xf32>
      %c0_11 = arith.constant 0 : index
      %c0_12 = arith.constant 0 : index
      %13 = vector.load %arg7[%c0_11, %c0_12] : memref<16x64xf32, #tpu.memory_space<vmem>>, vector<16x64xf32>
      tpu.vector_store %arg7[%c0_11, %c0_12], %12 {strides = array<i32>} : memref<16x64xf32, #tpu.memory_space<vmem>>, vector<16x64xf32>,
    } else {
    }
    %c0 = arith.constant 0 : index
    %c0_1 = arith.constant 0 : index
    %3 = vector.load %arg7[%c0, %c0_1] : memref<16x64xf32, #tpu.memory_space<vmem>>, vector<16x64xf32>
    %c0_2 = arith.constant 0 : index
    %c0_3 = arith.constant 0 : index
    %4 = vector.load %arg3[%c0_2, %c0_3] : memref<16x32xbf16, #tpu.memory_space<vmem>>, vector<16x32xbf16>
    %c0_4 = arith.constant 0 : index
    %c0_5 = arith.constant 0 : index
    %5 = vector.load %arg4[%c0_4, %c0_5] : memref<32x64xbf16, #tpu.memory_space<vmem>>, vector<32x64xbf16>
    %cst = arith.constant dense<0.000000e+00> : vector<16x64xf32>
    %6 = tpu.matmul %4, %5, %cst {dimension_numbers = #tpu.dot_dimension_numbers<[1], [0], [0], [1], [0, 0, 1, 1], [], []>} : vector<16x32xbf16>, vector<32x64xbf16>, vector<16x64xf32> -> vector<16x64xf32>
    %7 = arith.addf %3, %6 : vector<16x64xf32>
    %c0_6 = arith.constant 0 : index
    %c0_7 = arith.constant 0 : index
    %8 = vector.load %arg7[%c0_6, %c0_7] : memref<16x64xf32, #tpu.memory_space<vmem>>, vector<16x64xf32>
    tpu.vector_store %arg7[%c0_6, %c0_7], %7 {strides = array<i32>} : memref<16x64xf32, #tpu.memory_space<vmem>>, vector<16x64xf32>,
    %c0_i32_8 = arith.constant 0 : i32
    %9 = arith.cmpi eq, %arg2, %c0_i32_8 : i32
    %10 = arith.extui %9 : i1 to i32
    %c0_i32_9 = arith.constant 0 : i32
    %11 = arith.cmpi ne, %10, %c0_i32_9 : i32
    scf.if %11 {
      %c0_10 = arith.constant 0 : index
      %c0_11 = arith.constant 0 : index
      %12 = vector.load %arg7[%c0_10, %c0_11] : memref<16x64xf32, #tpu.memory_space<vmem>>, vector<16x64xf32>
      %c0_12 = arith.constant 0 : index
      %c0_13 = arith.constant 0 : index
      %13 = vector.load %arg5[%c0_12, %c0_13] : memref<1x64xf32, #tpu.memory_space<vmem>>, vector<1x64xf32>
      %14 = vector.broadcast %13 : vector<1x64xf32> to vector<16x64xf32>
      %15 = arith.addf %12, %14 : vector<16x64xf32>
      %16 = arith.truncf %15 : vector<16x64xf32> to vector<16x64xbf16>
      %c0_14 = arith.constant 0 : index
      %c0_15 = arith.constant 0 : index
      %17 = vector.load %arg6[%c0_14, %c0_15] : memref<16x64xbf16, #tpu.memory_space<vmem>>, vector<16x64xbf16>
      tpu.vector_store %arg6[%c0_14, %c0_15], %16 {strides = array<i32>} : memref<16x64xbf16, #tpu.memory_space<vmem>>, vector<16x64xbf16>,
    } else {
    }
    return
  }
  func.func @transform_0(%arg0: i32, %arg1: i32, %arg2: i32) -> (i32, i32) {
    %c0_i32 = arith.constant 0 : i32
    return %arg0, %arg2 : i32, i32
  }
  func.func @transform_1(%arg0: i32, %arg1: i32, %arg2: i32) -> (i32, i32) {
    %c0_i32 = arith.constant 0 : i32
    return %arg2, %arg1 : i32, i32
  }
  func.func @transform_2(%arg0: i32, %arg1: i32, %arg2: i32) -> (i32, i32) {
    %c0_i32 = arith.constant 0 : i32
    %c0_i32_0 = arith.constant 0 : i32
    return %c0_i32, %arg1 : i32, i32
  }
  func.func @transform_3(%arg0: i32, %arg1: i32, %arg2: i32) -> (i32, i32) {
    %c0_i32 = arith.constant 0 : i32
    return %arg0, %arg1 : i32, i32
  }
}

module attributes {stable_mosaic.version = 11 : i64} {
  func.func @_mlp_res_ln_kernel(%arg0: i32, %arg1: i32, %arg2: memref<16x32xbf16, #tpu.memory_space<vmem>>, %arg3: memref<32x128xbf16, #tpu.memory_space<vmem>>, %arg4: memref<1x128xf32, #tpu.memory_space<vmem>>, %arg5: memref<128x32xbf16, #tpu.memory_space<vmem>>, %arg6: memref<1x32xf32, #tpu.memory_space<vmem>>, %arg7: memref<16x32xbf16, #tpu.memory_space<vmem>>, %arg8: memref<1x32xf32, #tpu.memory_space<vmem>>, %arg9: memref<1x32xf32, #tpu.memory_space<vmem>>, %arg10: memref<16x32xbf16, #tpu.memory_space<vmem>>, %arg11: memref<16x32xf32, #tpu.memory_space<vmem>>) attributes {dimension_semantics = [#tpu.dimension_semantics<parallel>, #tpu.dimension_semantics<arbitrary>], iteration_bounds = array<i64: 1, 1>, scalar_prefetch = 0 : i64, scratch_operands = 1 : i64, tpu.core_type = #tpu.core_type<tc>, window_params = [{transform_indices = @transform_0, window_bounds = array<i64: 16, 32>}, {transform_indices = @transform_1, window_bounds = array<i64: 32, 128>}, {transform_indices = @transform_2, window_bounds = array<i64: 1, 128>}, {transform_indices = @transform_3, window_bounds = array<i64: 128, 32>}, {pipeline_mode = #tpu.pipeline_mode<synchronous>, transform_indices = @transform_4, window_bounds = array<i64: 1, 32>}, {transform_indices = @transform_5, window_bounds = array<i64: 16, 32>}, {pipeline_mode = #tpu.pipeline_mode<synchronous>, transform_indices = @transform_6, window_bounds = array<i64: 1, 32>}, {pipeline_mode = #tpu.pipeline_mode<synchronous>, transform_indices = @transform_7, window_bounds = array<i64: 1, 32>}, {transform_indices = @transform_8, window_bounds = array<i64: 16, 32>}]} {
    %c0_i32 = arith.constant 0 : i32
    %0 = arith.cmpi eq, %arg1, %c0_i32 : i32
    %1 = arith.extui %0 : i1 to i32
    %c0_i32_0 = arith.constant 0 : i32
    %2 = arith.cmpi ne, %1, %c0_i32_0 : i32
    scf.if %2 {
      %cst_16 = arith.constant 0.000000e+00 : f32
      %20 = vector.broadcast %cst_16 : f32 to vector<16x32xf32>
      %c0_17 = arith.constant 0 : index
      %c0_18 = arith.constant 0 : index
      %21 = vector.load %arg11[%c0_17, %c0_18] : memref<16x32xf32, #tpu.memory_space<vmem>>, vector<16x32xf32>
      tpu.vector_store %arg11[%c0_17, %c0_18], %20 {strides = array<i32>} : memref<16x32xf32, #tpu.memory_space<vmem>>, vector<16x32xf32>,
    } else {
    }
    %c0 = arith.constant 0 : index
    %c0_1 = arith.constant 0 : index
    %3 = vector.load %arg2[%c0, %c0_1] : memref<16x32xbf16, #tpu.memory_space<vmem>>, vector<16x32xbf16>
    %c0_2 = arith.constant 0 : index
    %c0_3 = arith.constant 0 : index
    %4 = vector.load %arg3[%c0_2, %c0_3] : memref<32x128xbf16, #tpu.memory_space<vmem>>, vector<32x128xbf16>
    %cst = arith.constant dense<0.000000e+00> : vector<16x128xf32>
    %5 = tpu.matmul %3, %4, %cst {dimension_numbers = #tpu.dot_dimension_numbers<[1], [0], [0], [1], [0, 0, 1, 1], [], []>} : vector<16x32xbf16>, vector<32x128xbf16>, vector<16x128xf32> -> vector<16x128xf32>
    %c0_4 = arith.constant 0 : index
    %c0_5 = arith.constant 0 : index
    %6 = vector.load %arg4[%c0_4, %c0_5] : memref<1x128xf32, #tpu.memory_space<vmem>>, vector<1x128xf32>
    %7 = vector.broadcast %6 : vector<1x128xf32> to vector<16x128xf32>
    %8 = arith.addf %5, %7 : vector<16x128xf32>
    %cst_6 = arith.constant 0.000000e+00 : f32
    %9 = vector.broadcast %cst_6 : f32 to vector<16x128xf32>
    %10 = arith.maximumf %8, %9 : vector<16x128xf32>
    %c0_7 = arith.constant 0 : index
    %c0_8 = arith.constant 0 : index
    %11 = vector.load %arg11[%c0_7, %c0_8] : memref<16x32xf32, #tpu.memory_space<vmem>>, vector<16x32xf32>
    %12 = arith.truncf %10 : vector<16x128xf32> to vector<16x128xbf16>
    %c0_9 = arith.constant 0 : index
    %c0_10 = arith.constant 0 : index
    %13 = vector.load %arg5[%c0_9, %c0_10] : memref<128x32xbf16, #tpu.memory_space<vmem>>, vector<128x32xbf16>
    %cst_11 = arith.constant dense<0.000000e+00> : vector<16x32xf32>
    %14 = tpu.matmul %12, %13, %cst_11 {dimension_numbers = #tpu.dot_dimension_numbers<[1], [0], [0], [1], [0, 0, 1, 1], [], []>} : vector<16x128xbf16>, vector<128x32xbf16>, vector<16x32xf32> -> vector<16x32xf32>
    %15 = arith.addf %11, %14 : vector<16x32xf32>
    %c0_12 = arith.constant 0 : index
    %c0_13 = arith.constant 0 : index
    %16 = vector.load %arg11[%c0_12, %c0_13] : memref<16x32xf32, #tpu.memory_space<vmem>>, vector<16x32xf32>
    tpu.vector_store %arg11[%c0_12, %c0_13], %15 {strides = array<i32>} : memref<16x32xf32, #tpu.memory_space<vmem>>, vector<16x32xf32>,
    %c0_i32_14 = arith.constant 0 : i32
    %17 = arith.cmpi eq, %arg1, %c0_i32_14 : i32
    %18 = arith.extui %17 : i1 to i32
    %c0_i32_15 = arith.constant 0 : i32
    %19 = arith.cmpi ne, %18, %c0_i32_15 : i32
    scf.if %19 {
      %c0_16 = arith.constant 0 : index
      %c0_17 = arith.constant 0 : index
      %20 = vector.load %arg11[%c0_16, %c0_17] : memref<16x32xf32, #tpu.memory_space<vmem>>, vector<16x32xf32>
      %c0_18 = arith.constant 0 : index
      %c0_19 = arith.constant 0 : index
      %21 = vector.load %arg6[%c0_18, %c0_19] : memref<1x32xf32, #tpu.memory_space<vmem>>, vector<1x32xf32>
      %22 = vector.broadcast %21 : vector<1x32xf32> to vector<16x32xf32>
      %23 = arith.addf %20, %22 : vector<16x32xf32>
      %c0_20 = arith.constant 0 : index
      %c0_21 = arith.constant 0 : index
      %24 = vector.load %arg7[%c0_20, %c0_21] : memref<16x32xbf16, #tpu.memory_space<vmem>>, vector<16x32xbf16>
      %25 = arith.extf %24 : vector<16x32xbf16> to vector<16x32xf32>
      %26 = arith.addf %23, %25 : vector<16x32xf32>
      %c0_22 = arith.constant 0 : index
      %c0_23 = arith.constant 0 : index
      %27 = vector.load %arg8[%c0_22, %c0_23] : memref<1x32xf32, #tpu.memory_space<vmem>>, vector<1x32xf32>
      %c0_24 = arith.constant 0 : index
      %c0_25 = arith.constant 0 : index
      %28 = vector.load %arg9[%c0_24, %c0_25] : memref<1x32xf32, #tpu.memory_space<vmem>>, vector<1x32xf32>
      %cst_26 = arith.constant dense<0.000000e+00> : vector<16xf32>
      %29 = vector.multi_reduction <add>, %26, %cst_26 [1] : vector<16x32xf32> to vector<16xf32>
      %30 = vector.shape_cast %29 : vector<16xf32> to vector<16x1xf32>
      %cst_27 = arith.constant 3.200000e+01 : f32
      %31 = vector.broadcast %cst_27 : f32 to vector<16x1xf32>
      %32 = arith.divf %30, %31 : vector<16x1xf32>
      %33 = vector.broadcast %32 : vector<16x1xf32> to vector<16x32xf32>
      %34 = arith.subf %26, %33 : vector<16x32xf32>
      %35 = arith.mulf %34, %34 : vector<16x32xf32>
      %cst_28 = arith.constant dense<0.000000e+00> : vector<16xf32>
      %36 = vector.multi_reduction <add>, %35, %cst_28 [1] : vector<16x32xf32> to vector<16xf32>
      %37 = vector.shape_cast %36 : vector<16xf32> to vector<16x1xf32>
      %cst_29 = arith.constant 3.200000e+01 : f32
      %38 = vector.broadcast %cst_29 : f32 to vector<16x1xf32>
      %39 = arith.divf %37, %38 : vector<16x1xf32>
      %cst_30 = arith.constant 9.99999974E-6 : f32
      %40 = vector.broadcast %cst_30 : f32 to vector<16x1xf32>
      %41 = arith.addf %39, %40 : vector<16x1xf32>
      %42 = math.rsqrt %41 : vector<16x1xf32>
      %43 = vector.broadcast %42 : vector<16x1xf32> to vector<16x32xf32>
      %44 = arith.mulf %34, %43 : vector<16x32xf32>
      %45 = vector.broadcast %27 : vector<1x32xf32> to vector<16x32xf32>
      %46 = arith.mulf %44, %45 : vector<16x32xf32>
      %47 = vector.broadcast %28 : vector<1x32xf32> to vector<16x32xf32>
      %48 = arith.addf %46, %47 : vector<16x32xf32>
      %49 = arith.truncf %48 : vector<16x32xf32> to vector<16x32xbf16>
      %c0_31 = arith.constant 0 : index
      %c0_32 = arith.constant 0 : index
      %50 = vector.load %arg10[%c0_31, %c0_32] : memref<16x32xbf16, #tpu.memory_space<vmem>>, vector<16x32xbf16>
      tpu.vector_store %arg10[%c0_31, %c0_32], %49 {strides = array<i32>} : memref<16x32xbf16, #tpu.memory_space<vmem>>, vector<16x32xbf16>,
    } else {
    }
    return
  }
  func.func @transform_0(%arg0: i32, %arg1: i32) -> (i32, i32) {
    %c0_i32 = arith.constant 0 : i32
    %c0_i32_0 = arith.constant 0 : i32
    return %arg0, %c0_i32 : i32, i32
  }
  func.func @transform_1(%arg0: i32, %arg1: i32) -> (i32, i32) {
    %c0_i32 = arith.constant 0 : i32
    %c0_i32_0 = arith.constant 0 : i32
    return %c0_i32, %arg1 : i32, i32
  }
  func.func @transform_2(%arg0: i32, %arg1: i32) -> (i32, i32) {
    %c0_i32 = arith.constant 0 : i32
    %c0_i32_0 = arith.constant 0 : i32
    return %c0_i32, %arg1 : i32, i32
  }
  func.func @transform_3(%arg0: i32, %arg1: i32) -> (i32, i32) {
    %c0_i32 = arith.constant 0 : i32
    %c0_i32_0 = arith.constant 0 : i32
    return %arg1, %c0_i32 : i32, i32
  }
  func.func @transform_4(%arg0: i32, %arg1: i32) -> (i32, i32) {
    %c0_i32 = arith.constant 0 : i32
    %c0_i32_0 = arith.constant 0 : i32
    %c0_i32_1 = arith.constant 0 : i32
    return %c0_i32, %c0_i32_0 : i32, i32
  }
  func.func @transform_5(%arg0: i32, %arg1: i32) -> (i32, i32) {
    %c0_i32 = arith.constant 0 : i32
    %c0_i32_0 = arith.constant 0 : i32
    return %arg0, %c0_i32 : i32, i32
  }
  func.func @transform_6(%arg0: i32, %arg1: i32) -> (i32, i32) {
    %c0_i32 = arith.constant 0 : i32
    %c0_i32_0 = arith.constant 0 : i32
    %c0_i32_1 = arith.constant 0 : i32
    return %c0_i32, %c0_i32_0 : i32, i32
  }
  func.func @transform_7(%arg0: i32, %arg1: i32) -> (i32, i32) {
    %c0_i32 = arith.constant 0 : i32
    %c0_i32_0 = arith.constant 0 : i32
    %c0_i32_1 = arith.constant 0 : i32
    return %c0_i32, %c0_i32_0 : i32, i32
  }
  func.func @transform_8(%arg0: i32, %arg1: i32) -> (i32, i32) {
    %c0_i32 = arith.constant 0 : i32
    %c0_i32_0 = arith.constant 0 : i32
    return %arg0, %c0_i32 : i32, i32
  }
}

module attributes {stable_mosaic.version = 11 : i64} {
  func.func @_linear_kernel(%arg0: i32, %arg1: i32, %arg2: i32, %arg3: memref<16x32xbf16, #tpu.memory_space<vmem>>, %arg4: memref<32x64xbf16, #tpu.memory_space<vmem>>, %arg5: memref<1x64xf32, #tpu.memory_space<vmem>>, %arg6: memref<16x64xf32, #tpu.memory_space<vmem>>) attributes {dimension_semantics = [#tpu.dimension_semantics<parallel>, #tpu.dimension_semantics<parallel>, #tpu.dimension_semantics<arbitrary>], iteration_bounds = array<i64: 1, 1, 1>, scalar_prefetch = 0 : i64, scratch_operands = 0 : i64, tpu.core_type = #tpu.core_type<tc>, window_params = [{transform_indices = @transform_0, window_bounds = array<i64: 16, 32>}, {transform_indices = @transform_1, window_bounds = array<i64: 32, 64>}, {transform_indices = @transform_2, window_bounds = array<i64: 1, 64>}, {transform_indices = @transform_3, window_bounds = array<i64: 16, 64>}]} {
    %c0_i32 = arith.constant 0 : i32
    %0 = arith.cmpi eq, %arg2, %c0_i32 : i32
    %1 = arith.extui %0 : i1 to i32
    %c0_i32_0 = arith.constant 0 : i32
    %2 = arith.cmpi ne, %1, %c0_i32_0 : i32
    scf.if %2 {
      %cst_10 = arith.constant 0.000000e+00 : f32
      %12 = vector.broadcast %cst_10 : f32 to vector<16x64xf32>
      %c0_11 = arith.constant 0 : index
      %c0_12 = arith.constant 0 : index
      %13 = vector.load %arg6[%c0_11, %c0_12] : memref<16x64xf32, #tpu.memory_space<vmem>>, vector<16x64xf32>
      tpu.vector_store %arg6[%c0_11, %c0_12], %12 {strides = array<i32>} : memref<16x64xf32, #tpu.memory_space<vmem>>, vector<16x64xf32>,
    } else {
    }
    %c0 = arith.constant 0 : index
    %c0_1 = arith.constant 0 : index
    %3 = vector.load %arg6[%c0, %c0_1] : memref<16x64xf32, #tpu.memory_space<vmem>>, vector<16x64xf32>
    %c0_2 = arith.constant 0 : index
    %c0_3 = arith.constant 0 : index
    %4 = vector.load %arg3[%c0_2, %c0_3] : memref<16x32xbf16, #tpu.memory_space<vmem>>, vector<16x32xbf16>
    %c0_4 = arith.constant 0 : index
    %c0_5 = arith.constant 0 : index
    %5 = vector.load %arg4[%c0_4, %c0_5] : memref<32x64xbf16, #tpu.memory_space<vmem>>, vector<32x64xbf16>
    %cst = arith.constant dense<0.000000e+00> : vector<16x64xf32>
    %6 = tpu.matmul %4, %5, %cst {dimension_numbers = #tpu.dot_dimension_numbers<[1], [0], [0], [1], [0, 0, 1, 1], [], []>} : vector<16x32xbf16>, vector<32x64xbf16>, vector<16x64xf32> -> vector<16x64xf32>
    %7 = arith.addf %3, %6 : vector<16x64xf32>
    %c0_6 = arith.constant 0 : index
    %c0_7 = arith.constant 0 : index
    %8 = vector.load %arg6[%c0_6, %c0_7] : memref<16x64xf32, #tpu.memory_space<vmem>>, vector<16x64xf32>
    tpu.vector_store %arg6[%c0_6, %c0_7], %7 {strides = array<i32>} : memref<16x64xf32, #tpu.memory_space<vmem>>, vector<16x64xf32>,
    %c0_i32_8 = arith.constant 0 : i32
    %9 = arith.cmpi eq, %arg2, %c0_i32_8 : i32
    %10 = arith.extui %9 : i1 to i32
    %c0_i32_9 = arith.constant 0 : i32
    %11 = arith.cmpi ne, %10, %c0_i32_9 : i32
    scf.if %11 {
      %c0_10 = arith.constant 0 : index
      %c0_11 = arith.constant 0 : index
      %12 = vector.load %arg6[%c0_10, %c0_11] : memref<16x64xf32, #tpu.memory_space<vmem>>, vector<16x64xf32>
      %c0_12 = arith.constant 0 : index
      %c0_13 = arith.constant 0 : index
      %13 = vector.load %arg5[%c0_12, %c0_13] : memref<1x64xf32, #tpu.memory_space<vmem>>, vector<1x64xf32>
      %14 = vector.broadcast %13 : vector<1x64xf32> to vector<16x64xf32>
      %15 = arith.addf %12, %14 : vector<16x64xf32>
      %c0_14 = arith.constant 0 : index
      %c0_15 = arith.constant 0 : index
      %16 = vector.load %arg6[%c0_14, %c0_15] : memref<16x64xf32, #tpu.memory_space<vmem>>, vector<16x64xf32>
      tpu.vector_store %arg6[%c0_14, %c0_15], %15 {strides = array<i32>} : memref<16x64xf32, #tpu.memory_space<vmem>>, vector<16x64xf32>,
    } else {
    }
    return
  }
  func.func @transform_0(%arg0: i32, %arg1: i32, %arg2: i32) -> (i32, i32) {
    %c0_i32 = arith.constant 0 : i32
    return %arg0, %arg2 : i32, i32
  }
  func.func @transform_1(%arg0: i32, %arg1: i32, %arg2: i32) -> (i32, i32) {
    %c0_i32 = arith.constant 0 : i32
    return %arg2, %arg1 : i32, i32
  }
  func.func @transform_2(%arg0: i32, %arg1: i32, %arg2: i32) -> (i32, i32) {
    %c0_i32 = arith.constant 0 : i32
    %c0_i32_0 = arith.constant 0 : i32
    return %c0_i32, %arg1 : i32, i32
  }
  func.func @transform_3(%arg0: i32, %arg1: i32, %arg2: i32) -> (i32, i32) {
    %c0_i32 = arith.constant 0 : i32
    return %arg0, %arg1 : i32, i32
  }
}

</mosaic_0001>

<bundles_post_ra>
// kernel: transformer_forward.33
= control target key start
LH: loop header
LB: loop body
LE: loop exit
PB: predicated region body
PF: predicated region fallthrough
CT: control target
= control target key end

     0   :  { %vm19_vm0 = vcmask 785408   ;;  %v151_v0 = vmov 0.0   ;;  %vm152_vm1 = vmmov 0   ;;  %vm47_vm2 = vcmask 261120   ;;  %s195_s1 = inlined_call_operand.vmem [shape: bf16[32,96], index: 1, kind: input, shape index: {}]   ;;  %s196_s0 = inlined_call_operand.vmem [shape: bf16[16,32], index: 0, kind: input, shape index: {}]   ;;  %s197_s2 = inlined_call_operand.vmem [shape: f32[1,96], index: 2, kind: input, shape index: {}]   ;;  %s198_s3 = inlined_call_operand.vmem [shape: bf16[16,96], index: 3, kind: output, shape index: {}]  }
   0x1   :  { %138 = vmatprep.subr.bf16.mxu0 %v151_v0  ;;  %v148_v1 = vld [vmem:[%s195_s1] sm:$0xff]   ;;  %142 = vmatprep.mubr.msk.bf16.mxu0 %vm152_vm1, %v151_v0  ;;  %20 = vst.msk [vmem:[#allocation2] sm:$0xff] %vm19_vm0, %v151_v0  ;;  %21 = vst.msk [vmem:[#allocation2 + $0x8] sm:$0xff] %vm19_vm0, %v151_v0  ;;  %v149_v2 = vld [vmem:[%s195_s1 + $0x8] sm:$0xff]   ;;  %vm119_vm3 = vcmask 781312  }
   0x2   :  { %139 = vmatpush3.bf16.msra.mxu0 %v148_v1  ;;  %v150_v3 = vld [vmem:[%s196_s0] sm:$0xff]  }
   0x3   :  { %140 = vmatprep.subr.bf16.mxu0 %v151_v0  ;;  %v130_v12 = vld [vmem:[%s197_s2] ss:$0 sm:$0xff] }
   0x6   :  { %141 = vmatpush3.bf16.msra.mxu0 %v149_v2 }
   0x8   :  { %v22_v4 = vld [vmem:[#allocation2] sm:$0xff]  ;;  %v23_v6 = vld [vmem:[#allocation2 + $0x8] sm:$0xff] }
   0x9   :  { %143 = vmatmul.mubr.msk.bf16.vlgmr.msra.gmra.mrb[0].mxu0 %vm47_vm2, %v150_v3 }
  0xdc   :  { %v85_v5 = vpop.f32.mrb[0].mxu0 }
  0xdd   :  { %v92_v7 = vadd.f32 %v85_v5, %v22_v4  ;;  %v144_v8 = vpop.f32.mrb[1].mxu0 }
  0xde   :  { %v88_v9 = vpop.f32.mrb[2].mxu0 }
  0xdf   :  { %95 = vst.msk [vmem:[#allocation2] sm:$0xff] %vm19_vm0, %v92_v7  ;;  %v93_v10 = vadd.f32 %v88_v9, %v23_v6  ;;  %v145_v11 = vpop.f32.mrb[3].mxu0 }
  0xe1   :  { %96 = vst.msk [vmem:[#allocation2 + $0x8] sm:$0xff] %vm19_vm0, %v93_v10 }
  0xe6   :  { %v100_v13 = vld [vmem:[#allocation2] sm:$0xff] }
  0xe7   :  { %v109_v14 = vadd.f32 %v130_v12, %v100_v13 }
  0xe8   :  { %v101_v15 = vld [vmem:[#allocation2 + $0x8] sm:$0xff] }
  0xe9   :  { %v133_v16 = vpack.c.bf16 %v109_v14, %v109_v14  ;;  %v110_v17 = vadd.f32 %v130_v12, %v101_v15 }
  0xeb   :  { %120 = vst.msk [vmem:[%s198_s3] sm:$0xf] %vm119_vm3, %v133_v16  ;;  %v134_v18 = vpack.c.bf16 %v110_v17, %v110_v17 }
  0xed   :  { %121 = vst.msk [vmem:[%s198_s3 + $0x4] sm:$0xf] %vm119_vm3, %v134_v18 }

// kernel: transformer_forward.34
= control target key start
LH: loop header
LB: loop body
LE: loop exit
PB: predicated region body
PF: predicated region fallthrough
CT: control target
= control target key end

     0   :  { %s775_s12 = smov 0   ;;  %s777_s13 = smov 0   ;;  %s849_s0 = inlined_call_operand.vmem [shape: bf16[2,8,8,4], index: 0, kind: input, shape index: {}]   ;;  %s850_s1 = inlined_call_operand.vmem [shape: bf16[2,8,8,4], index: 1, kind: input, shape index: {}]   ;;  %s851_s2 = inlined_call_operand.vmem [shape: bf16[2,8,8,4], index: 2, kind: input, shape index: {}]   ;;  %s852_s3 = inlined_call_operand.vmem [shape: bf16[2,8,8,4], index: 3, kind: output, shape index: {}]  }
   0x1   :  { %s779_s14 = smov 0   ;;  %s781_s15 = smov 0  }
   0x2   :  { %s783_s16 = smov 0  }
   0x3 LB: > { %s35_s17 = sadd.s32 1, %s741_s14  ;;  %s39_s18 = sadd.s32 1, %s745_s15  ;;  %s749_s16 = sphi %s783_s16, %s13_s16   ;;  %s745_s15 = sphi %s781_s15, %s856_s15   ;;  %s741_s14 = sphi %s779_s14, %s855_s14   ;;  %s737_s13 = sphi %s777_s13, %s854_s13   ;;  %s733_s12 = sphi %s775_s12, %s853_s12  }
   0x4   : > { %p37_p0 = scmp.ge.s32.totalorder %s35_s17, 8  ;;  %p630_p1 = scmp.ge.s32.totalorder %s749_s16, 1 }
   0x5   : > { %p217_p2 = scmp.lt.s32.totalorder %s749_s16, 17 }
   0x6   : > { %s858_s17 = smov (%p37_p0, %s35_s17), 0  ;;  %s860_s18 = smov (!%p37_p0, %s39_s18), %s745_s15 }
   0x7   : > { %p218_p3 = pnand %p630_p1, %p217_p2  ;;  %p41_p4 = scmp.ge.s32.totalorder %s860_s18, 2 }
   0x8   : > { %p275_p5 = scmp.lt.s32.totalorder (!%p218_p3), %s737_s13, 1  ;;  %p277_p6 = scmp.lt.s32.totalorder (!%p218_p3), %s733_s12, 7  ;;  %vm328_vm0 = vcmask (!%p218_p3), 31744   ;;  %v751_v0 = vmov (!%p218_p3), 0.0   ;;  %vm752_vm1 = vmmov (!%p218_p3), 0   ;;  %vm325_vm2 = vcmask (!%p218_p3), 7168  }
   0x9   : > { %s862_s18 = smov (%p41_p4, %s860_s18), 0  ;;  %221 = sbr.rel (%p218_p3) target bundleno = 827 (0x33b), region = 32 }
   0xa   : > { %647 = vmatprep.subr.bf16.mxu0 (!%p218_p3), %v751_v0  ;;  %329 = vst.msk [vmem:[#allocation4] sm:$0xff] (!%p218_p3), %vm328_vm0, %v751_v0  ;;  %649 = vmatprep.mubr.msk.bf16.mxu0 (!%p218_p3), %vm752_vm1, %v751_v0  ;;  %v753_v5 = vmov (!%p218_p3), -inf   ;;  %vm382_vm3 = vcmask (!%p218_p3), 64512   ;;  %v754_v11 = vmov (!%p218_p3), 0   ;;  %vm417_vm4 = vcmask (!%p218_p3), 1043456  }
   0xb   : > { %653 = vmatprep.subr.bf16.mxu1 (!%p218_p3), %v751_v0  ;;  %655 = vmatprep.mubr.msk.bf16.mxu1 (!%p218_p3), %vm752_vm1, %v751_v0  ;;  %326 = vst.msk [vmem:[#allocation2] sm:$0xff] (!%p218_p3), %vm325_vm2, %v753_v5  ;;  %327 = vst.msk [vmem:[#allocation3] sm:$0xff] (!%p218_p3), %vm325_vm2, %v751_v0  ;;  %vm477_vm5 = vcmask (!%p218_p3), 27648  }
   0xc   : > { %703 = vset.pattern.permute.xlu0 (!%p218_p3), %v754_v11  ;;  %704 = vset.pattern.permute.xlu1 (!%p218_p3), %v754_v11 }
  0x10   : > { %s864_s13 = smov (!%p275_p5, %s737_s13), 1  ;;  %s866_s12 = smov (!%p277_p6, %s733_s12), 7 }
  0x11   : > { %s631_s19 = sshll.u32 %s864_s13, 3  ;;  %v406_v32 = vld [vmem:[#allocation4] sm:$0xff] }
  0x12   : > { %s283_s20 = sadd.s32 %s631_s19, %s866_s12  ;;  %v381_v12 = vld [vmem:[#allocation2] sm:$0xff]  ;;  %v398_v26 = vld [vmem:[#allocation3] sm:$0xff] }
  0x13   : > { %s806_s21 = sshll.u32 %s283_s20, 2 }
  0x14   : > { %s296_s24 = scalar_lea.vmem %s850_s1, %s806_s21  ;;  %s285_s27 = scalar_lea.vmem %s849_s0, %s806_s21 }
  0x15   : > { %v332_v1 = vld [vmem:[%s296_s24] sm:$0xf]  ;;  %s307_s30 = scalar_lea.vmem %s851_s2, %s806_s21  ;;  %s318_s6 = scalar_lea.vmem %s852_s3, %s806_s21 }
  0x16   : > { %v339_v2 = vsel %vm328_vm0, %v332_v1, 0  ;;  %v330_v3 = vld [vmem:[%s285_s27] sm:$0xf] }
  0x17   : > { %648 = vmatpush3.bf16.xpose.msra.mxu0 %v339_v2  ;;  %v331_v4 = vmul.bf16 1056980736, %v330_v3  ;;  %v333_v16 = vld [vmem:[%s307_s30] sm:$0xf] }
  0x18   : > { %v419_v17 = vsel %vm417_vm4, %v333_v16, 0 }
  0x19   : > { %654 = vmatpush3.bf16.msra.mxu1 %v419_v17 }
  0x1e   : > { %650 = vmatmul.mubr.msk.bf16.vlgmr.msra.gmra.mrb[0].mxu0 %vm328_vm0, %v331_v4 }
  0xf1   : > { %v375_v6 = vpop.f32.mrb[0].mxu0 }
  0xf2   : > { %v651_v7 = vpop.f32.mrb[1].mxu0  ;;  %v383_v8 = vsel %vm382_vm3, %v375_v6, -inf }
  0xf3   : > { %384 = vmax.xlane.f32.xlu0 %v383_v8  ;;  %v378_v9 = vpop.f32.mrb[2].mxu0 }
  0xf4   : > { %v652_v10 = vpop.f32.mrb[3].mxu0 }
 0x180   : > { %v385_v13 = vpop.xlane.xlu0 %384 }
 0x181   : > { %v386_v14 = vmax.f32 %v381_v12, %v385_v13 }
 0x183   : > { %v387_v15 = vsub.f32 %v381_v12, %v386_v14  ;;  %463 = vst.msk [vmem:[#allocation2] sm:$0xff] %vm325_vm2, %v386_v14  ;;  %392 = vperm.xlu0 %703, %v386_v14  }
 0x185   : > { %v388_v24 = vmul.f32 1.442695, %v387_v15 }
 0x202   : > { %v393_v18 = vpop.permute.xlu0 %392 }
 0x203   : > { %v395_v19 = vsub.f32 %v375_v6, %v393_v18 }
 0x205   : > { %v396_v20 = vmul.f32 1.442695, %v395_v19 }
 0x207   : > { %705 = vpow2.f32 %v396_v20 }
 0x208   : > { %707 = vpow2.f32 %v388_v24 }
 0x211   : > { %v706_v21 = vpop.eup %705 }
 0x212   : > { %v400_v22 = vsel %vm382_vm3, %v706_v21, 0.0  ;;  %v413_v23 = vpack.c.bf16 %v706_v21, %v706_v21  ;;  %v708_v25 = vpop.eup %707 }
 0x213   : > { %401 = vadd.xlane.f32.xlu1 %v400_v22  ;;  %v399_v27 = vmul.f32 %v708_v25, %v398_v26 }
 0x214   : > { %656 = vmatmul.mubr.msk.bf16.vlgmr.msra.gmra.mrb[0].mxu1 %vm382_vm3, %v413_v23 }
 0x224   : > { %409 = vperm.xlu1 %704, %v708_v25  }
 0x2a0   : > { %v402_v28 = vpop.xlane.xlu1 %401 }
 0x2a1   : > { %v403_v29 = vadd.f32 %v402_v28, %v399_v27 }
 0x2a3   : > { %405 = vst.msk [vmem:[#allocation3] sm:$0xff] %vm325_vm2, %v403_v29 }
 0x2a4   : > { %v410_v33 = vpop.permute.xlu1 %409 }
 0x2a5   : > { %v412_v34 = vmul.f32 %v410_v33, %v406_v32 }
 0x2aa   : > { %v468_v30 = vld [vmem:[#allocation3] sm:$0xff] }
 0x2ab   : > { %709 = vrcp.f32 %v468_v30 }
 0x2b5   : > { %v710_v31 = vpop.eup %709 }
 0x2b6   : > { %472 = vperm.xlu1 %704, %v710_v31  }
 0x2e7   : > { %v455_v35 = vpop.f32.mrb[0].mxu1 }
 0x2e8   : > { %v461_v36 = vadd.f32 %v455_v35, %v412_v34  ;;  %v657_v37 = vpop.f32.mrb[1].mxu1 }
 0x2e9   : > { %v458_v38 = vpop.f32.mrb[2].mxu1 }
 0x2ea   : > { %462 = vst.msk [vmem:[#allocation4] sm:$0xff] %vm328_vm0, %v461_v36  ;;  %v658_v39 = vpop.f32.mrb[3].mxu1 }
 0x2f1   : > { %v467_v40 = vld [vmem:[#allocation4] sm:$0xff] }
 0x335   : > { %v473_v41 = vpop.permute.xlu1 %472 }
 0x336   : > { %v475_v42 = vmul.f32 %v473_v41, %v467_v40 }
 0x338   : > { %v476_v43 = vpack.c.bf16 %v475_v42, %v475_v42 }
 0x33a   : > { %478 = vst.msk [vmem:[%s318_s6] sm:$0xf] %vm477_vm5, %v476_v43 }
 0x33b PF: > { %s13_s16 = sadd.s32 1, %s749_s16   ;;  %s853_s12 = smov %s741_s14 }
 0x33c   : > { %p10_p7 = scmp.ge.s32.totalorder %s13_s16, 18   ;;  %s854_s13 = smov %s745_s15 }
 0x33d   : > { %s855_s14 = smov %s858_s17  ;;  %s856_s15 = smov %s862_s18 }
 0x33e   :  { %12 = sbr.rel (!%p10_p7) target bundleno = 3 (0x3), region = 76 }

// kernel: transformer_forward.36
= control target key start
LH: loop header
LB: loop body
LE: loop exit
PB: predicated region body
PF: predicated region fallthrough
CT: control target
= control target key end

     0   :  { %vm19_vm0 = vcmask 261120   ;;  %v150_v0 = vmov 0.0   ;;  %vm151_vm1 = vmmov 0   ;;  %vm118_vm2 = vcmask 257024   ;;  %s195_s1 = inlined_call_operand.vmem [shape: bf16[32,32], index: 1, kind: input, shape index: {}]   ;;  %s196_s0 = inlined_call_operand.vmem [shape: bf16[16,32], index: 0, kind: input, shape index: {}]   ;;  %s197_s2 = inlined_call_operand.vmem [shape: f32[1,32], index: 2, kind: input, shape index: {}]   ;;  %s198_s3 = inlined_call_operand.vmem [shape: bf16[16,32], index: 3, kind: output, shape index: {}]  }
   0x1   :  { %137 = vmatprep.subr.bf16.mxu0 %v150_v0  ;;  %v147_v1 = vld [vmem:[%s195_s1] sm:$0xff]   ;;  %141 = vmatprep.mubr.msk.bf16.mxu0 %vm151_vm1, %v150_v0  ;;  %20 = vst.msk [vmem:[#allocation2] sm:$0xff] %vm19_vm0, %v150_v0  ;;  %21 = vst.msk [vmem:[#allocation2 + $0x8] sm:$0xff] %vm19_vm0, %v150_v0  ;;  %v148_v2 = vld [vmem:[%s195_s1 + $0x8] sm:$0xff]  }
   0x2   :  { %138 = vmatpush3.bf16.msra.mxu0 %v147_v1  ;;  %v149_v3 = vld [vmem:[%s196_s0] sm:$0xff]  }
   0x3   :  { %139 = vmatprep.subr.bf16.mxu0 %v150_v0  ;;  %v129_v12 = vld [vmem:[%s197_s2] ss:$0 sm:$0xff] }
   0x6   :  { %140 = vmatpush3.bf16.msra.mxu0 %v148_v2 }
   0x8   :  { %v22_v4 = vld [vmem:[#allocation2] sm:$0xff]  ;;  %v23_v6 = vld [vmem:[#allocation2 + $0x8] sm:$0xff] }
   0x9   :  { %142 = vmatmul.mubr.msk.bf16.vlgmr.msra.gmra.mrb[0].mxu0 %vm19_vm0, %v149_v3 }
  0xdc   :  { %v85_v5 = vpop.f32.mrb[0].mxu0 }
  0xdd   :  { %v92_v7 = vadd.f32 %v85_v5, %v22_v4  ;;  %v143_v8 = vpop.f32.mrb[1].mxu0 }
  0xde   :  { %v88_v9 = vpop.f32.mrb[2].mxu0 }
  0xdf   :  { %94 = vst.msk [vmem:[#allocation2] sm:$0xff] %vm19_vm0, %v92_v7  ;;  %v93_v10 = vadd.f32 %v88_v9, %v23_v6  ;;  %v144_v11 = vpop.f32.mrb[3].mxu0 }
  0xe1   :  { %95 = vst.msk [vmem:[#allocation2 + $0x8] sm:$0xff] %vm19_vm0, %v93_v10 }
  0xe6   :  { %v99_v13 = vld [vmem:[#allocation2] sm:$0xff] }
  0xe7   :  { %v108_v14 = vadd.f32 %v129_v12, %v99_v13 }
  0xe8   :  { %v100_v15 = vld [vmem:[#allocation2 + $0x8] sm:$0xff] }
  0xe9   :  { %v132_v16 = vpack.c.bf16 %v108_v14, %v108_v14  ;;  %v109_v17 = vadd.f32 %v129_v12, %v100_v15 }
  0xeb   :  { %119 = vst.msk [vmem:[%s198_s3] sm:$0xf] %vm118_vm2, %v132_v16  ;;  %v133_v18 = vpack.c.bf16 %v109_v17, %v109_v17 }
  0xed   :  { %120 = vst.msk [vmem:[%s198_s3 + $0x4] sm:$0xf] %vm118_vm2, %v133_v18 }

// kernel: transformer_forward.35
= control target key start
LH: loop header
LB: loop body
LE: loop exit
PB: predicated region body
PF: predicated region fallthrough
CT: control target
= control target key end

     0   :  { %vm28_vm0 = vcmask 261120   ;;  %v220_v0 = vmov 0.0   ;;  %vm221_vm1 = vmmov 0   ;;  %vm178_vm2 = vcmask 257024   ;;  %s293_s1 = inlined_call_operand.vmem [shape: bf16[32,32], index: 1, kind: input, shape index: {}]   ;;  %s294_s0 = inlined_call_operand.vmem [shape: bf16[16,32], index: 0, kind: input, shape index: {}]   ;;  %s295_s3 = inlined_call_operand.vmem [shape: bf16[16,32], index: 3, kind: input, shape index: {}]   ;;  %s296_s2 = inlined_call_operand.vmem [shape: f32[1,32], index: 2, kind: input, shape index: {}]   ;;  %s297_s4 = inlined_call_operand.vmem [shape: f32[1,32], index: 4, kind: input, shape index: {}]   ;;  %s298_s5 = inlined_call_operand.vmem [shape: f32[1,32], index: 5, kind: input, shape index: {}]   ;;  %s299_s6 = inlined_call_operand.vmem [shape: bf16[16,32], index: 6, kind: output, shape index: {}]  }
   0x1   :  { %203 = vmatprep.subr.bf16.mxu0 %v220_v0  ;;  %v213_v1 = vld [vmem:[%s293_s1] sm:$0xff]   ;;  %207 = vmatprep.mubr.msk.bf16.mxu0 %vm221_vm1, %v220_v0  ;;  %29 = vst.msk [vmem:[#allocation2] sm:$0xff] %vm28_vm0, %v220_v0  ;;  %30 = vst.msk [vmem:[#allocation2 + $0x8] sm:$0xff] %vm28_vm0, %v220_v0  ;;  %v214_v2 = vld [vmem:[%s293_s1 + $0x8] sm:$0xff]  }
   0x2   :  { %204 = vmatpush3.bf16.msra.mxu0 %v213_v1  ;;  %v215_v3 = vld [vmem:[%s294_s0] sm:$0xff]  }
   0x3   :  { %205 = vmatprep.subr.bf16.mxu0 %v220_v0  ;;  %v197_v12 = vld [vmem:[%s295_s3] sm:$0xff]  }
   0x4   :  { %v189_v13 = vld [vmem:[%s296_s2] ss:$0 sm:$0xff]  ;;  %v198_v14 = vunpack.c.l.bf16 %v197_v12  ;;  %v199_v17 = vunpack.c.h.bf16 %v197_v12 }
   0x5   :  { %v190_v41 = vld [vmem:[%s297_s4] ss:$0 sm:$0xff] }
   0x6   :  { %206 = vmatpush3.bf16.msra.mxu0 %v214_v2  ;;  %v191_v43 = vld [vmem:[%s298_s5] ss:$0 sm:$0xff] }
   0x8   :  { %v31_v4 = vld [vmem:[#allocation2] sm:$0xff]  ;;  %v32_v6 = vld [vmem:[#allocation2 + $0x8] sm:$0xff] }
   0x9   :  { %208 = vmatmul.mubr.msk.bf16.vlgmr.msra.gmra.mrb[0].mxu0 %vm28_vm0, %v215_v3 }
  0xdc   :  { %v94_v5 = vpop.f32.mrb[0].mxu0 }
  0xdd   :  { %v101_v7 = vadd.f32 %v94_v5, %v31_v4  ;;  %v209_v8 = vpop.f32.mrb[1].mxu0 }
  0xde   :  { %v97_v9 = vpop.f32.mrb[2].mxu0 }
  0xdf   :  { %103 = vst.msk [vmem:[#allocation2] sm:$0xff] %vm28_vm0, %v101_v7  ;;  %v102_v10 = vadd.f32 %v97_v9, %v32_v6  ;;  %v210_v11 = vpop.f32.mrb[3].mxu0 }
  0xe1   :  { %104 = vst.msk [vmem:[#allocation2 + $0x8] sm:$0xff] %vm28_vm0, %v102_v10 }
  0xe6   :  { %v108_v15 = vld [vmem:[#allocation2] sm:$0xff] }
  0xe7   :  { %v117_v16 = vadd.f32 %v189_v13, %v108_v15 }
  0xe8   :  { %v109_v18 = vld [vmem:[#allocation2 + $0x8] sm:$0xff] }
  0xe9   :  { %v123_v19 = vadd.f32 %v198_v14, %v117_v16  ;;  %v118_v20 = vadd.f32 %v189_v13, %v109_v18 }
  0xeb   :  { %v127_v21 = vsel %vm28_vm0, %v123_v19, 0.0  ;;  %v124_v22 = vadd.f32 %v199_v17, %v118_v20 }
  0xec   :  { %128 = vadd.xlane.f32.xlu0 %v127_v21 }
  0xed   :  { %v130_v23 = vsel %vm28_vm0, %v124_v22, 0.0 }
  0xf0   :  { %131 = vadd.xlane.f32.xlu0 %v130_v23 }
 0x179   :  { %v129_v24 = vpop.xlane.xlu0 %128 }
 0x17a   :  { %v134_v25 = vmul.f32 0.03125, %v129_v24 }
 0x17c   :  { %v136_v26 = vsub.f32 %v123_v19, %v134_v25 }
 0x17d   :  { %v132_v27 = vpop.xlane.xlu0 %131 }
 0x17e   :  { %v135_v28 = vmul.f32 0.03125, %v132_v27  ;;  %v138_v29 = vmul.f32 %v136_v26, %v136_v26 }
 0x180   :  { %v137_v30 = vsub.f32 %v124_v22, %v135_v28  ;;  %v140_v31 = vsel %vm28_vm0, %v138_v29, 0.0 }
 0x181   :  { %141 = vadd.xlane.f32.xlu1 %v140_v31 }
 0x182   :  { %v139_v32 = vmul.f32 %v137_v30, %v137_v30 }
 0x184   :  { %v143_v33 = vsel %vm28_vm0, %v139_v32, 0.0 }
 0x185   :  { %144 = vadd.xlane.f32.xlu1 %v143_v33 }
 0x20e   :  { %v142_v34 = vpop.xlane.xlu1 %141 }
 0x20f   :  { %v146_v35 = vmul.f32 0.03125, %v142_v34 }
 0x211   :  { %v148_v36 = vadd.f32 1e-05, %v146_v35 }
 0x212   :  { %v145_v37 = vpop.xlane.xlu1 %144 }
 0x213   :  { %216 = vrsqrt.f32 %v148_v36  ;;  %v147_v38 = vmul.f32 0.03125, %v145_v37 }
 0x215   :  { %v149_v39 = vadd.f32 1e-05, %v147_v38 }
 0x217   :  { %218 = vrsqrt.f32 %v149_v39 }
 0x21d   :  { %v217_v40 = vpop.eup %216 }
 0x21e   :  { %v152_v42 = vmul.f32 %v217_v40, %v136_v26 }
 0x220   :  { %v160_v44 = vmul.f32 %v190_v41, %v152_v42 }
 0x221   :  { %v219_v45 = vpop.eup %218 }
 0x222   :  { %v168_v46 = vadd.f32 %v191_v43, %v160_v44  ;;  %v153_v47 = vmul.f32 %v219_v45, %v137_v30 }
 0x224   :  { %v194_v48 = vpack.c.bf16 %v168_v46, %v168_v46  ;;  %v161_v49 = vmul.f32 %v190_v41, %v153_v47 }
 0x226   :  { %179 = vst.msk [vmem:[%s299_s6] sm:$0xf] %vm178_vm2, %v194_v48  ;;  %v169_v50 = vadd.f32 %v191_v43, %v161_v49 }
 0x228   :  { %v195_v51 = vpack.c.bf16 %v169_v50, %v169_v50 }
 0x22a   :  { %180 = vst.msk [vmem:[%s299_s6 + $0x4] sm:$0xf] %vm178_vm2, %v195_v51 }

// kernel: transformer_forward.37
= control target key start
LH: loop header
LB: loop body
LE: loop exit
PB: predicated region body
PF: predicated region fallthrough
CT: control target
= control target key end

     0   :  { %vm19_vm0 = vcmask 523264   ;;  %v151_v0 = vmov 0.0   ;;  %vm152_vm1 = vmmov 0   ;;  %vm47_vm2 = vcmask 261120   ;;  %s195_s1 = inlined_call_operand.vmem [shape: bf16[32,64], index: 1, kind: input, shape index: {}]   ;;  %s196_s0 = inlined_call_operand.vmem [shape: bf16[16,32], index: 0, kind: input, shape index: {}]   ;;  %s197_s2 = inlined_call_operand.vmem [shape: f32[1,64], index: 2, kind: input, shape index: {}]   ;;  %s198_s3 = inlined_call_operand.vmem [shape: bf16[16,64], index: 3, kind: output, shape index: {}]  }
   0x1   :  { %138 = vmatprep.subr.bf16.mxu0 %v151_v0  ;;  %v148_v1 = vld [vmem:[%s195_s1] sm:$0xff]   ;;  %142 = vmatprep.mubr.msk.bf16.mxu0 %vm152_vm1, %v151_v0  ;;  %20 = vst.msk [vmem:[#allocation2] sm:$0xff] %vm19_vm0, %v151_v0  ;;  %21 = vst.msk [vmem:[#allocation2 + $0x8] sm:$0xff] %vm19_vm0, %v151_v0  ;;  %v149_v2 = vld [vmem:[%s195_s1 + $0x8] sm:$0xff]   ;;  %vm119_vm3 = vcmask 519168  }
   0x2   :  { %139 = vmatpush3.bf16.msra.mxu0 %v148_v1  ;;  %v150_v3 = vld [vmem:[%s196_s0] sm:$0xff]  }
   0x3   :  { %140 = vmatprep.subr.bf16.mxu0 %v151_v0  ;;  %v130_v12 = vld [vmem:[%s197_s2] ss:$0 sm:$0xff] }
   0x6   :  { %141 = vmatpush3.bf16.msra.mxu0 %v149_v2 }
   0x8   :  { %v22_v4 = vld [vmem:[#allocation2] sm:$0xff]  ;;  %v23_v6 = vld [vmem:[#allocation2 + $0x8] sm:$0xff] }
   0x9   :  { %143 = vmatmul.mubr.msk.bf16.vlgmr.msra.gmra.mrb[0].mxu0 %vm47_vm2, %v150_v3 }
  0xdc   :  { %v85_v5 = vpop.f32.mrb[0].mxu0 }
  0xdd   :  { %v92_v7 = vadd.f32 %v85_v5, %v22_v4  ;;  %v144_v8 = vpop.f32.mrb[1].mxu0 }
  0xde   :  { %v88_v9 = vpop.f32.mrb[2].mxu0 }
  0xdf   :  { %95 = vst.msk [vmem:[#allocation2] sm:$0xff] %vm19_vm0, %v92_v7  ;;  %v93_v10 = vadd.f32 %v88_v9, %v23_v6  ;;  %v145_v11 = vpop.f32.mrb[3].mxu0 }
  0xe1   :  { %96 = vst.msk [vmem:[#allocation2 + $0x8] sm:$0xff] %vm19_vm0, %v93_v10 }
  0xe6   :  { %v100_v13 = vld [vmem:[#allocation2] sm:$0xff] }
  0xe7   :  { %v109_v14 = vadd.f32 %v130_v12, %v100_v13 }
  0xe8   :  { %v101_v15 = vld [vmem:[#allocation2 + $0x8] sm:$0xff] }
  0xe9   :  { %v133_v16 = vpack.c.bf16 %v109_v14, %v109_v14  ;;  %v110_v17 = vadd.f32 %v130_v12, %v101_v15 }
  0xeb   :  { %120 = vst.msk [vmem:[%s198_s3] sm:$0xf] %vm119_vm3, %v133_v16  ;;  %v134_v18 = vpack.c.bf16 %v110_v17, %v110_v17 }
  0xed   :  { %121 = vst.msk [vmem:[%s198_s3 + $0x4] sm:$0xf] %vm119_vm3, %v134_v18 }

// kernel: transformer_forward.28
= control target key start
LH: loop header
LB: loop body
LE: loop exit
PB: predicated region body
PF: predicated region fallthrough
CT: control target
= control target key end

     0   :  { %vm34_vm0 = vcmask 261120   ;;  %v387_v0 = vmov 0.0   ;;  %vm388_vm1 = vmmov 0   ;;  %vm299_vm2 = vcmask 257024   ;;  %s497_s1 = inlined_call_operand.vmem [shape: bf16[32,128], index: 1, kind: input, shape index: {}]   ;;  %s498_s3 = inlined_call_operand.vmem [shape: bf16[128,32], index: 3, kind: input, shape index: {}]   ;;  %s499_s0 = inlined_call_operand.vmem [shape: bf16[16,32], index: 0, kind: input, shape index: {}, may-alias: {0,5}]   ;;  %s500_s2 = inlined_call_operand.vmem [shape: f32[1,128], index: 2, kind: input, shape index: {}]   ;;  %s501_s5 = inlined_call_operand.vmem [shape: bf16[16,32], index: 5, kind: input, shape index: {}, may-alias: {0,5}]   ;;  %s502_s4 = inlined_call_operand.vmem [shape: f32[1,32], index: 4, kind: input, shape index: {}]   ;;  %s503_s6 = inlined_call_operand.vmem [shape: f32[1,32], index: 6, kind: input, shape index: {}]   ;;  %s504_s7 = inlined_call_operand.vmem [shape: f32[1,32], index: 7, kind: input, shape index: {}]   ;;  %s505_s8 = inlined_call_operand.vmem [shape: bf16[16,32], index: 8, kind: output, shape index: {}]  }
   0x1   :  { %342 = vmatprep.subr.bf16.mxu0 %v387_v0  ;;  %v372_v1 = vld [vmem:[%s497_s1] sm:$0xff]   ;;  %346 = vmatprep.mubr.msk.bf16.mxu0 %vm388_vm1, %v387_v0  ;;  %35 = vst.msk [vmem:[#allocation2] sm:$0xff] %vm34_vm0, %v387_v0  ;;  %36 = vst.msk [vmem:[#allocation2 + $0x8] sm:$0xff] %vm34_vm0, %v387_v0  ;;  %v373_v2 = vld [vmem:[%s497_s1 + $0x8] sm:$0xff]  }
   0x2   :  { %350 = vmatprep.subr.bf16.mxu1 %v387_v0  ;;  %366 = vmatprep.mubr.msk.bf16.mxu1 %vm388_vm1, %v387_v0  ;;  %v375_v3 = vld [vmem:[%s498_s3] sm:$0xff]   ;;  %v376_v5 = vld [vmem:[%s498_s3 + $0x8] sm:$0xff]   ;;  %v377_v6 = vld [vmem:[%s498_s3 + $0x10] sm:$0xff]  }
   0x3   :  { %343 = vmatpush3.bf16.msra.mxu0 %v372_v1  ;;  %v374_v4 = vld [vmem:[%s499_s0] sm:$0xff]   ;;  %351 = vmatpush3.bf16.msra.mxu1 %v375_v3  ;;  %v378_v7 = vld [vmem:[%s498_s3 + $0x18] sm:$0xff]   ;;  %v380_v9 = vld [vmem:[%s498_s3 + $0x28] sm:$0xff]  }
   0x4   :  { %344 = vmatprep.subr.bf16.mxu0 %v387_v0  ;;  %352 = vmatprep.subr.bf16.mxu1 %v387_v0  ;;  %v379_v8 = vld [vmem:[%s498_s3 + $0x20] sm:$0xff]   ;;  %v381_v10 = vld [vmem:[%s498_s3 + $0x30] sm:$0xff]   ;;  %v382_v11 = vld [vmem:[%s498_s3 + $0x38] sm:$0xff]  }
   0x5   :  { %v306_v12 = vld [vmem:[%s500_s2] ss:$0 sm:$0xff] }
   0x6   :  { %v327_v30 = vld [vmem:[%s501_s5] sm:$0xff]  }
   0x7   :  { %345 = vmatpush3.bf16.msra.mxu0 %v373_v2  ;;  %353 = vmatpush3.bf16.msra.mxu1 %v376_v5  ;;  %v319_v31 = vld [vmem:[%s502_s4] ss:$0 sm:$0xff]  ;;  %v328_v32 = vunpack.c.l.bf16 %v327_v30  ;;  %v329_v35 = vunpack.c.h.bf16 %v327_v30 }
   0x8   :  { %354 = vmatprep.subr.bf16.mxu1 %v387_v0  ;;  %v114_v22 = vld [vmem:[#allocation2] sm:$0xff]  ;;  %v115_v24 = vld [vmem:[#allocation2 + $0x8] sm:$0xff] }
   0x9   :  { %v320_v59 = vld [vmem:[%s503_s6] ss:$0 sm:$0xff] }
   0xa   :  { %347 = vmatmul.mubr.msk.bf16.vlgmr.msra.gmra.mrb[0].mxu0 %vm34_vm0, %v374_v4  ;;  %v321_v61 = vld [vmem:[%s504_s7] ss:$0 sm:$0xff] }
   0xb   :  { %355 = vmatpush3.bf16.msra.mxu1 %v377_v6 }
   0xc   :  { %356 = vmatprep.subr.bf16.mxu1 %v387_v0 }
   0xf   :  { %357 = vmatpush3.bf16.msra.mxu1 %v378_v7 }
  0x10   :  { %358 = vmatprep.subr.bf16.mxu1 %v387_v0 }
  0x13   :  { %359 = vmatpush3.bf16.msra.mxu1 %v379_v8 }
  0x14   :  { %360 = vmatprep.subr.bf16.mxu1 %v387_v0 }
  0x17   :  { %361 = vmatpush3.bf16.msra.mxu1 %v380_v9 }
  0x18   :  { %362 = vmatprep.subr.bf16.mxu1 %v387_v0 }
  0x1b   :  { %363 = vmatpush3.bf16.msra.mxu1 %v381_v10 }
  0x1c   :  { %364 = vmatprep.subr.bf16.mxu1 %v387_v0 }
  0x1f   :  { %365 = vmatpush3.bf16.msra.mxu1 %v382_v11 }
  0xdd   :  { %v105_v13 = vpop.f32.mrb[0].mxu0 }
  0xde   :  { %v106_v14 = vadd.f32 %v306_v12, %v105_v13  ;;  %v348_v15 = vpop.f32.mrb[1].mxu0 }
  0xdf   :  { %v108_v16 = vpop.f32.mrb[2].mxu0 }
  0xe0   :  { %v109_v17 = vadd.f32 %v306_v12, %v108_v16  ;;  %v349_v18 = vpop.f32.mrb[3].mxu0  ;;  %v112_v19 = vmax.f32 %v106_v14, 0.0 }
  0xe2   :  { %v113_v20 = vmax.f32 %v109_v17, 0.0 }
  0xe4   :  { %v116_v21 = vpack.c.bf16 %v113_v20, %v112_v19 }
  0xe6   :  { %367 = vmatmul.mubr.bf16.vlgmr.msra.gmra.mrb[0].mxu1 %v116_v21 }
 0x1b9   :  { %v215_v23 = vpop.f32.mrb[0].mxu1 }
 0x1ba   :  { %v222_v25 = vadd.f32 %v215_v23, %v114_v22  ;;  %v368_v26 = vpop.f32.mrb[1].mxu1 }
 0x1bb   :  { %v218_v27 = vpop.f32.mrb[2].mxu1 }
 0x1bc   :  { %224 = vst.msk [vmem:[#allocation2] sm:$0xff] %vm34_vm0, %v222_v25  ;;  %v223_v28 = vadd.f32 %v218_v27, %v115_v24  ;;  %v369_v29 = vpop.f32.mrb[3].mxu1 }
 0x1be   :  { %225 = vst.msk [vmem:[#allocation2 + $0x8] sm:$0xff] %vm34_vm0, %v223_v28 }
 0x1c3   :  { %v229_v33 = vld [vmem:[#allocation2] sm:$0xff] }
 0x1c4   :  { %v238_v34 = vadd.f32 %v319_v31, %v229_v33 }
 0x1c5   :  { %v230_v36 = vld [vmem:[#allocation2 + $0x8] sm:$0xff] }
 0x1c6   :  { %v244_v37 = vadd.f32 %v328_v32, %v238_v34  ;;  %v239_v38 = vadd.f32 %v319_v31, %v230_v36 }
 0x1c8   :  { %v248_v39 = vsel %vm34_vm0, %v244_v37, 0.0  ;;  %v245_v40 = vadd.f32 %v329_v35, %v239_v38 }
 0x1c9   :  { %249 = vadd.xlane.f32.xlu0 %v248_v39 }
 0x1ca   :  { %v251_v41 = vsel %vm34_vm0, %v245_v40, 0.0 }
 0x1cd   :  { %252 = vadd.xlane.f32.xlu0 %v251_v41 }
 0x256   :  { %v250_v42 = vpop.xlane.xlu0 %249 }
 0x257   :  { %v255_v43 = vmul.f32 0.03125, %v250_v42 }
 0x259   :  { %v257_v44 = vsub.f32 %v244_v37, %v255_v43 }
 0x25a   :  { %v253_v45 = vpop.xlane.xlu0 %252 }
 0x25b   :  { %v256_v46 = vmul.f32 0.03125, %v253_v45  ;;  %v259_v47 = vmul.f32 %v257_v44, %v257_v44 }
 0x25d   :  { %v258_v48 = vsub.f32 %v245_v40, %v256_v46  ;;  %v261_v49 = vsel %vm34_vm0, %v259_v47, 0.0 }
 0x25e   :  { %262 = vadd.xlane.f32.xlu1 %v261_v49 }
 0x25f   :  { %v260_v50 = vmul.f32 %v258_v48, %v258_v48 }
 0x261   :  { %v264_v51 = vsel %vm34_vm0, %v260_v50, 0.0 }
 0x262   :  { %265 = vadd.xlane.f32.xlu1 %v264_v51 }
 0x2eb   :  { %v263_v52 = vpop.xlane.xlu1 %262 }
 0x2ec   :  { %v267_v53 = vmul.f32 0.03125, %v263_v52 }
 0x2ee   :  { %v269_v54 = vadd.f32 1e-05, %v267_v53 }
 0x2ef   :  { %v266_v55 = vpop.xlane.xlu1 %265 }
 0x2f0   :  { %383 = vrsqrt.f32 %v269_v54  ;;  %v268_v56 = vmul.f32 0.03125, %v266_v55 }
 0x2f2   :  { %v270_v57 = vadd.f32 1e-05, %v268_v56 }
 0x2f4   :  { %385 = vrsqrt.f32 %v270_v57 }
 0x2fa   :  { %v384_v58 = vpop.eup %383 }
 0x2fb   :  { %v273_v60 = vmul.f32 %v384_v58, %v257_v44 }
 0x2fd   :  { %v281_v62 = vmul.f32 %v320_v59, %v273_v60 }
 0x2fe   :  { %v386_v63 = vpop.eup %385 }
 0x2ff   :  { %v289_v0 = vadd.f32 %v321_v61, %v281_v62  ;;  %v274_v1 = vmul.f32 %v386_v63, %v258_v48 }
 0x301   :  { %v324_v2 = vpack.c.bf16 %v289_v0, %v289_v0  ;;  %v282_v3 = vmul.f32 %v320_v59, %v274_v1 }
 0x303   :  { %300 = vst.msk [vmem:[%s505_s8] sm:$0xf] %vm299_vm2, %v324_v2  ;;  %v290_v4 = vadd.f32 %v321_v61, %v282_v3 }
 0x305   :  { %v325_v5 = vpack.c.bf16 %v290_v4, %v290_v4 }
 0x307   :  { %301 = vst.msk [vmem:[%s505_s8 + $0x4] sm:$0xf] %vm299_vm2, %v325_v5 }

// kernel: transformer_forward.49
= control target key start
LH: loop header
LB: loop body
LE: loop exit
PB: predicated region body
PF: predicated region fallthrough
CT: control target
= control target key end

     0   :  { %v178_v1 = vmov 0.0   ;;  %vm179_vm0 = vmmov 0   ;;  %vm20_vm1 = vcmask 523264   ;;  %s233_s0 = inlined_call_operand.vmem [shape: bf16[16,32], index: 0, kind: input, shape index: {}]   ;;  %s234_s1 = inlined_call_operand.vmem [shape: bf16[32,64], index: 1, kind: input, shape index: {}]   ;;  %s235_s2 = inlined_call_operand.vmem [shape: f32[1,64], index: 2, kind: input, shape index: {}]   ;;  %s236_s3 = inlined_call_operand.hbm [shape: f32[16,64], index: 3, kind: output, shape index: {}]  }
   0x1   :  { %v151_v0 = vld [vmem:[%s234_s1] sm:$0xff]   ;;  %138 = vmatprep.subr.bf16.mxu0 %v178_v1  ;;  %v152_v2 = vld [vmem:[%s234_s1 + $0x8] sm:$0xff]   ;;  %142 = vmatprep.mubr.msk.bf16.mxu0 %vm179_vm0, %v178_v1 }
   0x2   :  { %139 = vmatpush3.bf16.msra.mxu0 %v151_v0 }
   0x3   :  { %140 = vmatprep.subr.bf16.mxu0 %v178_v1 }
   0x4   :  { %8 = vsyncpa [#allocation3], 0  ;;  %21 = vst.msk [vmem:[#allocation2] sm:$0xff] %vm20_vm1, %v178_v1  ;;  %v153_v3 = vld [vmem:[%s233_s0] sm:$0xff]   ;;  %vm48_vm2 = vcmask 261120   ;;  %s180_s0 = smov [#allocation2]  }
   0x5   :  { %22 = vst.msk [vmem:[#allocation2 + $0x8] sm:$0xff] %vm20_vm1, %v178_v1  ;;  %v134_v12 = vld [vmem:[%s235_s2] ss:$0 sm:$0xff]  ;;  %s119_s19 = sshll.u32 %s180_s0, 4  ;;  %s120_s19 = int_to_ptr.vmem [resolvable:$true] %s119_s19 }
   0x6   :  { %141 = vmatpush3.bf16.msra.mxu0 %v152_v2  ;;  %s154_s20 = scalar_lea.vmem %s120_s19, 256  ;;  %p159_p1 = scmp.lt.s32.totalorder %s120_s19, %s120_s19 }
   0x7   :  { %p155_p0 = scmp.ne.s32.totalorder %s120_s19, %s154_s20  ;;  %p160_p2 = scmp.lt.s32.totalorder %s154_s20, %s154_s20 }
   0x9   :  { %143 = vmatmul.mubr.msk.bf16.vlgmr.msra.gmra.mrb[0].mxu0 %vm48_vm2, %v153_v3  ;;  %p161_p3 = por %p160_p2, %p159_p1 }
   0xb   :  { %v23_v4 = vld [vmem:[#allocation2] sm:$0xff]  ;;  %p162_p4 = pnand %p161_p3, %p155_p0 }
   0xc   :  { %v24_v6 = vld [vmem:[#allocation2 + $0x8] sm:$0xff] }
  0xdc   :  { %v86_v5 = vpop.f32.mrb[0].mxu0 }
  0xdd   :  { %v93_v7 = vadd.f32 %v86_v5, %v23_v4  ;;  %v144_v8 = vpop.f32.mrb[1].mxu0 }
  0xde   :  { %v89_v9 = vpop.f32.mrb[2].mxu0 }
  0xdf   :  { %96 = vst.msk [vmem:[#allocation2] sm:$0xff] %vm20_vm1, %v93_v7  ;;  %v94_v10 = vadd.f32 %v89_v9, %v24_v6  ;;  %v145_v11 = vpop.f32.mrb[3].mxu0 }
  0xe1   :  { %97 = vst.msk [vmem:[#allocation2 + $0x8] sm:$0xff] %vm20_vm1, %v94_v10 }
  0xe6   :  { %v101_v13 = vld [vmem:[#allocation2] sm:$0xff] }
  0xe7   :  { %v110_v14 = vadd.f32 %v134_v12, %v101_v13 }
  0xe8   :  { %v102_v15 = vld [vmem:[#allocation2 + $0x8] sm:$0xff] }
  0xe9   :  { %v111_v16 = vadd.f32 %v134_v12, %v102_v15  ;;  %112 = vst.msk [vmem:[#allocation2] sm:$0xff] %vm20_vm1, %v110_v14 }
  0xeb   :  { %113 = vst.msk [vmem:[#allocation2 + $0x8] sm:$0xff] %vm20_vm1, %v111_v16 }
  0xec   :  { %165 = shalt.err (!%p162_p4)
}
  0xed   :  { %s166_s22 = scalar_lea.hbm %s236_s3, 256 }
  0xee   :  { %p167_p5 = scmp.ne.s32.totalorder %s236_s3, %s166_s22  ;;  %p170_p6 = scmp.lt.u32.totalorder %s166_s22, %s236_s3 }
  0xf0   :  { %p172_p7 = pnand %p170_p6, %p167_p5 }
  0xf2   :  { %175 = shalt.err (!%p172_p7)
}
  0xf3   :  { %s181_s27 = smov 128   ;;  %s182_s28 = smov 8  }
  0xf4   :  { %125 = dma.vmem_to_hbm [thread:$0]  %s120_s19, 256, %s236_s3, [#allocation3], %s181_s27, %s181_s27, %s182_s28  }
  0xf5   :  { %176 = dma.done.wait [#allocation3], 256  }
  0xf6   :  { %177 = vsyncadd [#allocation3], 4294967040 }
  0xf7   :  { %129 = vsyncpa [#allocation3], 1 }

</bundles_post_ra>
